<compile_context>
chip_gen: v6e
topology: v6e:2x2x1
jax: 0.10.0
libtpu: 0.0.40
codegen_flags: <defaults>
</compile_context>

<pallas_src>
import functools

import numpy as np
import jax
import jax.numpy as jnp
from jax import lax
from jax.experimental import pallas as pl
from jax.experimental.pallas import tpu as pltpu

# ---- problem sizes (small, consistent with the module) ----
B = 2
H = W = 16
C_IN = C_OUT = 16          # residual requires in == out; must equal SFB embed_dim
C_TMP = 32                 # tmp_channels of the collapsible block
EMBED = 16                 # SFB(embed_dim=16)
C_HALF = EMBED // 2        # SpectralTransform inner width
P = H * W                  # flattened spatial positions (lane axis)
WF = W // 2 + 1            # rfft bins along W
PF = H * WF                # flattened frequency bins
W_SHIFT = W.bit_length() - 1

assert C_IN == EMBED == C_OUT
assert (W & (W - 1)) == 0 and (H & (H - 1)) == 0   # mask math assumes powers of two


# ---------------- constant builders (host-side, cached) ----------------
@functools.lru_cache(maxsize=None)
def _make_fft_mats(h_sz, w_sz):
    """Dense rfft2/irfft2 (norm='ortho') operators over flattened spatial dims."""
    wf = w_sz // 2 + 1
    m = np.arange(h_sz)[:, None]
    hh = np.arange(h_sz)[None, :]
    k = np.arange(wf)[:, None]
    ww = np.arange(w_sz)[None, :]
    ph_h = (m * hh).astype(np.float64) / h_sz               # (H, H)
    ph_w = (k * ww).astype(np.float64) / w_sz                # (WF, W)
    phase = 2.0 * np.pi * (ph_h[:, None, :, None] + ph_w[None, :, None, :])  # (H,WF,H,W)
    scale = 1.0 / np.sqrt(h_sz * w_sz)
    fre = (np.cos(phase) * scale).reshape(h_sz * wf, h_sz * w_sz).astype(np.float32)
    fim = (-np.sin(phase) * scale).reshape(h_sz * wf, h_sz * w_sz).astype(np.float32)
    # inverse (C2R along W, complex ifft along H), ortho normalized
    c = np.full((wf,), 2.0)
    c[0] = 1.0
    if w_sz % 2 == 0:
        c[-1] = 1.0
    cfull = np.tile(c, h_sz).astype(np.float32)              # index m*WF+k -> c[k]
    ire = (fre.T * cfull[None, :]).astype(np.float32)        # (P, PF)
    iim = (fim.T * cfull[None, :]).astype(np.float32)        # (P, PF)
    return fre, fim, ire, iim


@functools.lru_cache(maxsize=None)
def _fft_constants(h_sz, w_sz):
    """Packed (channels-as-rows layout) FFT operators, bf16, built once per (H, W)."""
    fre, fim, ire, iim = _make_fft_mats(h_sz, w_sz)
    bf = jnp.bfloat16
    fwd = jnp.stack([jnp.asarray(fre.T, bf), jnp.asarray(fim.T, bf)], axis=0)  # (2, P, PF)
    inv = jnp.stack([jnp.asarray(ire.T, bf), jnp.asarray(iim.T, bf)], axis=0)  # (2, PF, P)
    return fwd, inv


def _prepare_params(params):
    """Collapse / repack the PyTorch-layout weights into two packed kernel operands."""
    f32 = jnp.float32
    bf16 = jnp.bfloat16

    # Collapse ResidualCollapsibleLinearBlock: wc[t,i,o] = sum_m w1[t,i,m] w2[m,o],
    # identity folded into the centre tap to absorb the `x +` residual.
    wc = jnp.einsum('tim,mo->tio', params['w1'], params['w2'])
    wc = wc.at[4].add(jnp.eye(C_IN, dtype=wc.dtype))

    def taps_oi(w9):   # (9, in, out) -> (9, out, in) per-tap weight blocks
        return jnp.transpose(w9, (0, 2, 1))

    # One bf16 block with all 27 per-tap (out,in) conv matrices: index = conv*9 + tap.
    wconv = jnp.concatenate(
        [taps_oi(wc), taps_oi(params['ws1']), taps_oi(params['ws2'])],
        axis=0).astype(bf16)                                        # (27, 16, 16)

    # FourierUnit 1x1 over interleaved [re, im] channels -> fused [W_re | W_im].
    wfu4 = params['wfu'].reshape(C_HALF, 2, C_HALF, 2)   # [out_c, out_part, in_c, in_part]
    wfur = jnp.concatenate([wfu4[:, 0, :, 0], wfu4[:, 1, :, 0]], axis=0)   # (16, 8)
    wfui = jnp.concatenate([wfu4[:, 0, :, 1], wfu4[:, 1, :, 1]], axis=0)   # (16, 8)
    wfri = jnp.concatenate([wfur, wfui], axis=1).astype(f32)               # (16, 16)

    def pad_block(a):   # zero-pad a small matrix into a (16, 32) slot
        a = jnp.asarray(a, f32)
        return jnp.pad(a, ((0, 16 - a.shape[0]), (0, 32 - a.shape[1])))

    # Every 1x1 weight and every bias in ONE packed f32 array (8 slots x 16 rows).
    wsmall = jnp.concatenate([
        pad_block(params['wf1'].T),                     # rows   0: 16 -> wf1  [0:8 , 0:16]
        pad_block(wfri),                                # rows  16: 32 -> wfri [...,0:16]
        pad_block(params['wf2'].T),                     # rows  32: 48 -> wf2  [...,0: 8]
        pad_block(params['wfus'].T),                    # rows  48: 64 -> wfus [...,0:32]
        pad_block(params['b2'].reshape(C_OUT, 1)),      # rows  64: 80, col 0
        pad_block(params['bs1'].reshape(EMBED, 1)),     # rows  80: 96, col 0
        pad_block(params['bs2'].reshape(EMBED, 1)),     # rows  96:112, col 0
        pad_block(params['bfus'].reshape(EMBED, 1)),    # rows 112:128, col 0
    ], axis=0)                                          # (128, 32) f32

    return wconv, wsmall


# ------------------------------ the Pallas kernel ------------------------------
def _sfb_kernel(x_ref, wconv_ref, wsmall_ref, fwd_ref, inv_ref, out_ref):
    f32 = jnp.float32
    bf16 = jnp.bfloat16

    x = x_ref[0]                                           # (C, P) = (16, 256) f32

    # ---- static slices of the packed small-weight / bias block ----
    wf1 = wsmall_ref[0:8, 0:16]          # (8, 16)
    wfri = wsmall_ref[16:32, 0:16]       # (16, 16)  fused [W_re | W_im]
    wf2 = wsmall_ref[32:48, 0:8]         # (16, 8)
    wfus = wsmall_ref[48:64, 0:32]       # (16, 32)
    b2 = wsmall_ref[64:80, 0:1]          # (16, 1)
    bs1 = wsmall_ref[80:96, 0:1]
    bs2 = wsmall_ref[96:112, 0:1]
    bfus = wsmall_ref[112:128, 0:1]

    # ---- per-tap boundary masks at (1, P), as 0/1 f32 (broadcast multiply) ----
    lane = lax.broadcasted_iota(jnp.int32, (1, P), 1)
    w_id = jnp.bitwise_and(lane, W - 1)
    h_id = jnp.right_shift(lane, W_SHIFT)
    w_ok = (w_id >= 1, None, w_id <= W - 2)
    h_ok = (h_id >= 1, None, h_id <= H - 2)
    masks = []
    for dy in range(3):
        for dx in range(3):
            m = h_ok[dy]
            if w_ok[dx] is not None:
                m = w_ok[dx] if m is None else jnp.logical_and(m, w_ok[dx])
            masks.append(None if m is None else m.astype(f32))

    def conv3x3(a, conv_idx, bias):
        """3x3 'SAME' conv as 9 accumulating (16,16)@(16,P) bf16 MXU dots (no im2col)."""
        out = None
        for t in range(9):
            dy, dx = divmod(t, 3)
            shift = (dy - 1) * W + (dx - 1)                # source offset along flat spatial
            tap = a if shift == 0 else pltpu.roll(a, (-shift) % P, axis=1)
            if masks[t] is not None:
                tap = tap * masks[t]                       # zero out-of-image taps
            w_t = wconv_ref[conv_idx * 9 + t]              # (16, 16) bf16
            d = jnp.dot(w_t, tap.astype(bf16), preferred_element_type=f32)
            out = d if out is None else out + d
        return out + bias

    # --- collapsed ResidualCollapsibleLinearBlock: ReLU(x + conv1x1(conv3x3(x)) + b) ---
    z = jnp.maximum(conv3x3(x, 0, b2), 0.0)

    # --- SFB spatial branch (ResB): conv -> LeakyReLU(0.1) -> conv, + residual ---
    s = conv3x3(z, 1, bs1)
    s = jnp.where(s > 0, s, 0.1 * s)
    s = conv3x3(s, 2, bs2) + z

    # --- SFB frequency branch: SpectralTransform + FourierUnit ---
    f1 = jnp.maximum(jnp.dot(wf1, z, preferred_element_type=f32), 0.0)       # (C/2, P)
    f1b = f1.astype(bf16)                                                    # cast once
    g_re = jnp.dot(f1b, fwd_ref[0], preferred_element_type=f32)              # (C/2, PF)
    g_im = jnp.dot(f1b, fwd_ref[1], preferred_element_type=f32)              # (C/2, PF)
    # fused FourierUnit 1x1: [W_re | W_im] @ [g_re; g_im]  (sublane concat is aligned)
    o = jnp.maximum(
        jnp.dot(wfri, jnp.concatenate([g_re, g_im], axis=0),
                preferred_element_type=f32), 0.0)                            # (C, PF)
    fu = (jnp.dot(o[0:C_HALF].astype(bf16), inv_ref[0], preferred_element_type=f32)
          + jnp.dot(o[C_HALF:].astype(bf16), inv_ref[1], preferred_element_type=f32))
    f = jnp.dot(wf2, f1 + fu, preferred_element_type=f32)                    # (C, P)

    # --- fusion: single f32 1x1 matmul over concat([S, F]) channels ---
    out = jnp.dot(wfus, jnp.concatenate([s, f], axis=0),
                  preferred_element_type=f32) + bfus
    out_ref[0] = out


# ------------------------------ wrapper ------------------------------
def residual_block_with_sfb(x_nchw, params):
    b, c, h_sz, w_sz = x_nchw.shape
    assert (c, h_sz, w_sz) == (C_IN, H, W)

    fwd_fft, inv_fft = _fft_constants(H, W)              # cached bf16 DFT operators
    wconv, wsmall = _prepare_params(params)

    # NCHW is already channels-on-sublanes / spatial-on-lanes: just flatten H, W.
    x_cp = x_nchw.reshape(b, C_IN, P)

    consts = [wconv, wsmall, fwd_fft, inv_fft]           # 4 constant DMAs (+1 for x)

    def const_spec(a):
        nd = a.ndim
        return pl.BlockSpec(a.shape, lambda i, _nd=nd: (0,) * _nd)

    out = pl.pallas_call(
        _sfb_kernel,
        out_shape=jax.ShapeDtypeStruct((b, C_OUT, P), jnp.float32),
        grid=(b,),
        in_specs=[pl.BlockSpec((1, C_IN, P), lambda i: (i, 0, 0))]
                 + [const_spec(a) for a in consts],
        out_specs=pl.BlockSpec((1, C_OUT, P), lambda i: (i, 0, 0)),
        compiler_params=pltpu.CompilerParams(
            dimension_semantics=("parallel",)),          # batch shards across v7x's 2 TCs
    )(x_cp, *consts)

    return out.reshape(b, C_OUT, H, W)                   # already NCHW — no transpose


# --------------------- pure-JAX reference (for verification) ---------------------
def reference_forward(x_nchw, params):
    hp = lax.Precision.HIGHEST
    x = jnp.transpose(x_nchw, (0, 2, 3, 1))  # NHWC

    def conv3x3(inp, w9, bias=None):
        w = w9.reshape(3, 3, w9.shape[1], w9.shape[2])   # HWIO
        out = lax.conv_general_dilated(inp, w, (1, 1), 'SAME',
                                       dimension_numbers=('NHWC', 'HWIO', 'NHWC'),
                                       precision=hp)
        return out if bias is None else out + bias

    def conv1x1(inp, wio, bias=None):
        out = jnp.einsum('bhwi,io->bhwo', inp, wio, precision=hp)
        return out if bias is None else out + bias

    z = jax.nn.relu(x + conv1x1(conv3x3(x, params['w1']), params['w2'], params['b2']))

    s = conv3x3(z, params['ws1'], params['bs1'])
    s = jnp.where(s > 0, s, 0.1 * s)
    s = conv3x3(s, params['ws2'], params['bs2']) + z

    f1 = jax.nn.relu(conv1x1(z, params['wf1']))
    ff = jnp.fft.rfft2(f1, axes=(1, 2), norm='ortho')
    st = jnp.stack([ff.real, ff.imag], axis=-1).reshape(ff.shape[:3] + (2 * C_HALF,))
    yy = jax.nn.relu(jnp.einsum('bhwi,oi->bhwo', st, params['wfu'], precision=hp))
    yy = yy.reshape(yy.shape[:3] + (C_HALF, 2))
    comp = lax.complex(yy[..., 0], yy[..., 1])
    fu = jnp.fft.irfft2(comp, s=(H, W), axes=(1, 2), norm='ortho')
    f = conv1x1(f1 + fu, params['wf2'])

    cat = jnp.concatenate([s, f], axis=-1)
    out = conv1x1(cat, params['wfus'], params['bfus'])
    return jnp.transpose(out, (0, 3, 1, 2))


if __name__ == "__main__":
    key = jax.random.PRNGKey(0)
    ks = jax.random.split(key, 14)

    def nrm(k, shape, scale=0.1):
        return jax.random.normal(k, shape, jnp.float32) * scale

    params = dict(
        w1=nrm(ks[0], (9, C_IN, C_TMP)),            # conv_expand 3x3 (no bias)
        w2=nrm(ks[1], (C_TMP, C_OUT)),              # conv_squeeze 1x1
        b2=nrm(ks[2], (1, C_OUT)),
        ws1=nrm(ks[3], (9, EMBED, EMBED)),          # ResB conv1
        bs1=nrm(ks[4], (1, EMBED)),
        ws2=nrm(ks[5], (9, EMBED, EMBED)),          # ResB conv2
        bs2=nrm(ks[6], (1, EMBED)),
        wf1=nrm(ks[7], (EMBED, C_HALF)),            # SpectralTransform conv1 (no bias)
        wfu=nrm(ks[8], (2 * C_HALF, 2 * C_HALF)),   # FourierUnit 1x1, (out,in), no bias
        wf2=nrm(ks[9], (C_HALF, EMBED)),            # SpectralTransform conv2 (no bias)
        wfus=nrm(ks[10], (2 * EMBED, EMBED)),       # fusion 1x1
        bfus=nrm(ks[11], (1, EMBED)),
    )
    x = jax.random.normal(ks[12], (B, C_IN, H, W), jnp.float32)   # NCHW like PyTorch

    out = jax.block_until_ready(residual_block_with_sfb(x, params))

    ref = jax.block_until_ready(reference_forward(x, params))
    np.testing.assert_allclose(np.asarray(out), np.asarray(ref), rtol=2e-2, atol=2e-2)

    print("KERNEL_OK")
</pallas_src>

<mosaic_0001>
module attributes {stable_mosaic.version = 11 : i64} {
  func.func @_sfb_kernel(%arg0: i32, %arg1: memref<1x16x256xf32, #tpu.memory_space<vmem>>, %arg2: memref<27x16x16xbf16, #tpu.memory_space<vmem>>, %arg3: memref<128x32xf32, #tpu.memory_space<vmem>>, %arg4: memref<2x256x144xbf16, #tpu.memory_space<vmem>>, %arg5: memref<2x144x256xbf16, #tpu.memory_space<vmem>>, %arg6: memref<1x16x256xf32, #tpu.memory_space<vmem>>) attributes {dimension_semantics = [#tpu.dimension_semantics<parallel>], iteration_bounds = array<i64: 2>, scalar_prefetch = 0 : i64, scratch_operands = 0 : i64, tpu.core_type = #tpu.core_type<tc>, window_params = [{transform_indices = @transform_0, window_bounds = array<i64: 1, 16, 256>}, {pipeline_mode = #tpu.pipeline_mode<synchronous>, transform_indices = @transform_1, window_bounds = array<i64: 27, 16, 16>}, {pipeline_mode = #tpu.pipeline_mode<synchronous>, transform_indices = @transform_2, window_bounds = array<i64: 128, 32>}, {pipeline_mode = #tpu.pipeline_mode<synchronous>, transform_indices = @transform_3, window_bounds = array<i64: 2, 256, 144>}, {pipeline_mode = #tpu.pipeline_mode<synchronous>, transform_indices = @transform_4, window_bounds = array<i64: 2, 144, 256>}, {transform_indices = @transform_5, window_bounds = array<i64: 1, 16, 256>}]} {
    %c0 = arith.constant 0 : index
    %c0_0 = arith.constant 0 : index
    %c0_1 = arith.constant 0 : index
    %0 = vector.load %arg1[%c0, %c0_0, %c0_1] : memref<1x16x256xf32, #tpu.memory_space<vmem>>, vector<1x16x256xf32>
    %1 = vector.shape_cast %0 : vector<1x16x256xf32> to vector<16x256xf32>
    %c0_2 = arith.constant 0 : index
    %c0_3 = arith.constant 0 : index
    %2 = vector.load %arg3[%c0_2, %c0_3] : memref<128x32xf32, #tpu.memory_space<vmem>>, vector<8x16xf32>
    %c16 = arith.constant 16 : index
    %c0_4 = arith.constant 0 : index
    %3 = vector.load %arg3[%c16, %c0_4] : memref<128x32xf32, #tpu.memory_space<vmem>>, vector<16x16xf32>
    %c32 = arith.constant 32 : index
    %c0_5 = arith.constant 0 : index
    %4 = vector.load %arg3[%c32, %c0_5] : memref<128x32xf32, #tpu.memory_space<vmem>>, vector<16x8xf32>
    %c48 = arith.constant 48 : index
    %c0_6 = arith.constant 0 : index
    %5 = vector.load %arg3[%c48, %c0_6] : memref<128x32xf32, #tpu.memory_space<vmem>>, vector<16x32xf32>
    %c64 = arith.constant 64 : index
    %c0_7 = arith.constant 0 : index
    %6 = vector.load %arg3[%c64, %c0_7] : memref<128x32xf32, #tpu.memory_space<vmem>>, vector<16x1xf32>
    %c80 = arith.constant 80 : index
    %c0_8 = arith.constant 0 : index
    %7 = vector.load %arg3[%c80, %c0_8] : memref<128x32xf32, #tpu.memory_space<vmem>>, vector<16x1xf32>
    %c96 = arith.constant 96 : index
    %c0_9 = arith.constant 0 : index
    %8 = vector.load %arg3[%c96, %c0_9] : memref<128x32xf32, #tpu.memory_space<vmem>>, vector<16x1xf32>
    %c112 = arith.constant 112 : index
    %c0_10 = arith.constant 0 : index
    %9 = vector.load %arg3[%c112, %c0_10] : memref<128x32xf32, #tpu.memory_space<vmem>>, vector<16x1xf32>
    %10 = tpu.iota {dimensions = array<i32: 1>} : vector<1x256xi32>
    %c15_i32 = arith.constant 15 : i32
    %11 = vector.broadcast %c15_i32 : i32 to vector<1x256xi32>
    %12 = arith.andi %10, %11 : vector<1x256xi32>
    %c4_i32 = arith.constant 4 : i32
    %13 = vector.broadcast %c4_i32 : i32 to vector<1x256xi32>
    %14 = arith.shrsi %10, %13 : vector<1x256xi32>
    %c1_i32 = arith.constant 1 : i32
    %15 = vector.broadcast %c1_i32 : i32 to vector<1x256xi32>
    %16 = arith.cmpi sge, %12, %15 : vector<1x256xi32>
    %c14_i32 = arith.constant 14 : i32
    %17 = vector.broadcast %c14_i32 : i32 to vector<1x256xi32>
    %18 = arith.cmpi sle, %12, %17 : vector<1x256xi32>
    %c1_i32_11 = arith.constant 1 : i32
    %19 = vector.broadcast %c1_i32_11 : i32 to vector<1x256xi32>
    %20 = arith.cmpi sge, %14, %19 : vector<1x256xi32>
    %c14_i32_12 = arith.constant 14 : i32
    %21 = vector.broadcast %c14_i32_12 : i32 to vector<1x256xi32>
    %22 = arith.cmpi sle, %14, %21 : vector<1x256xi32>
    %23 = arith.andi %20, %16 : vector<1x256xi1>
    %24 = arith.extui %23 : vector<1x256xi1> to vector<1x256xi32>
    %25 = arith.sitofp %24 : vector<1x256xi32> to vector<1x256xf32>
    %26 = arith.extui %20 : vector<1x256xi1> to vector<1x256xi32>
    %27 = arith.sitofp %26 : vector<1x256xi32> to vector<1x256xf32>
    %28 = arith.andi %20, %18 : vector<1x256xi1>
    %29 = arith.extui %28 : vector<1x256xi1> to vector<1x256xi32>
    %30 = arith.sitofp %29 : vector<1x256xi32> to vector<1x256xf32>
    %31 = arith.extui %16 : vector<1x256xi1> to vector<1x256xi32>
    %32 = arith.sitofp %31 : vector<1x256xi32> to vector<1x256xf32>
    %33 = arith.extui %18 : vector<1x256xi1> to vector<1x256xi32>
    %34 = arith.sitofp %33 : vector<1x256xi32> to vector<1x256xf32>
    %35 = arith.andi %22, %16 : vector<1x256xi1>
    %36 = arith.extui %35 : vector<1x256xi1> to vector<1x256xi32>
    %37 = arith.sitofp %36 : vector<1x256xi32> to vector<1x256xf32>
    %38 = arith.extui %22 : vector<1x256xi1> to vector<1x256xi32>
    %39 = arith.sitofp %38 : vector<1x256xi32> to vector<1x256xf32>
    %40 = arith.andi %22, %18 : vector<1x256xi1>
    %41 = arith.extui %40 : vector<1x256xi1> to vector<1x256xi32>
    %42 = arith.sitofp %41 : vector<1x256xi32> to vector<1x256xf32>
    %c17_i32 = arith.constant 17 : i32
    %43 = tpu.dynamic_rotate %1 by %c17_i32 dim 1 : vector<16x256xf32>, i32 -> vector<16x256xf32>
    %44 = vector.broadcast %25 : vector<1x256xf32> to vector<16x256xf32>
    %45 = arith.mulf %43, %44 : vector<16x256xf32>
    %c0_13 = arith.constant 0 : index
    %c0_14 = arith.constant 0 : index
    %c0_15 = arith.constant 0 : index
    %46 = vector.load %arg2[%c0_13, %c0_14, %c0_15] : memref<27x16x16xbf16, #tpu.memory_space<vmem>>, vector<1x16x16xbf16>
    %47 = vector.shape_cast %46 : vector<1x16x16xbf16> to vector<16x16xbf16>
    %48 = arith.truncf %45 : vector<16x256xf32> to vector<16x256xbf16>
    %cst = arith.constant dense<0.000000e+00> : vector<16x256xf32>
    %49 = tpu.matmul %47, %48, %cst {dimension_numbers = #tpu.dot_dimension_numbers<[1], [0], [0], [1], [0, 0, 1, 1], [], []>} : vector<16x16xbf16>, vector<16x256xbf16>, vector<16x256xf32> -> vector<16x256xf32>
    %c16_i32 = arith.constant 16 : i32
    %50 = tpu.dynamic_rotate %1 by %c16_i32 dim 1 : vector<16x256xf32>, i32 -> vector<16x256xf32>
    %51 = vector.broadcast %27 : vector<1x256xf32> to vector<16x256xf32>
    %52 = arith.mulf %50, %51 : vector<16x256xf32>
    %c1 = arith.constant 1 : index
    %c0_16 = arith.constant 0 : index
    %c0_17 = arith.constant 0 : index
    %53 = vector.load %arg2[%c1, %c0_16, %c0_17] : memref<27x16x16xbf16, #tpu.memory_space<vmem>>, vector<1x16x16xbf16>
    %54 = vector.shape_cast %53 : vector<1x16x16xbf16> to vector<16x16xbf16>
    %55 = arith.truncf %52 : vector<16x256xf32> to vector<16x256xbf16>
    %cst_18 = arith.constant dense<0.000000e+00> : vector<16x256xf32>
    %56 = tpu.matmul %54, %55, %cst_18 {dimension_numbers = #tpu.dot_dimension_numbers<[1], [0], [0], [1], [0, 0, 1, 1], [], []>} : vector<16x16xbf16>, vector<16x256xbf16>, vector<16x256xf32> -> vector<16x256xf32>
    %57 = arith.addf %49, %56 : vector<16x256xf32>
    %c15_i32_19 = arith.constant 15 : i32
    %58 = tpu.dynamic_rotate %1 by %c15_i32_19 dim 1 : vector<16x256xf32>, i32 -> vector<16x256xf32>
    %59 = vector.broadcast %30 : vector<1x256xf32> to vector<16x256xf32>
    %60 = arith.mulf %58, %59 : vector<16x256xf32>
    %c2 = arith.constant 2 : index
    %c0_20 = arith.constant 0 : index
    %c0_21 = arith.constant 0 : index
    %61 = vector.load %arg2[%c2, %c0_20, %c0_21] : memref<27x16x16xbf16, #tpu.memory_space<vmem>>, vector<1x16x16xbf16>
    %62 = vector.shape_cast %61 : vector<1x16x16xbf16> to vector<16x16xbf16>
    %63 = arith.truncf %60 : vector<16x256xf32> to vector<16x256xbf16>
    %cst_22 = arith.constant dense<0.000000e+00> : vector<16x256xf32>
    %64 = tpu.matmul %62, %63, %cst_22 {dimension_numbers = #tpu.dot_dimension_numbers<[1], [0], [0], [1], [0, 0, 1, 1], [], []>} : vector<16x16xbf16>, vector<16x256xbf16>, vector<16x256xf32> -> vector<16x256xf32>
    %65 = arith.addf %57, %64 : vector<16x256xf32>
    %c1_i32_23 = arith.constant 1 : i32
    %66 = tpu.dynamic_rotate %1 by %c1_i32_23 dim 1 : vector<16x256xf32>, i32 -> vector<16x256xf32>
    %67 = vector.broadcast %32 : vector<1x256xf32> to vector<16x256xf32>
    %68 = arith.mulf %66, %67 : vector<16x256xf32>
    %c3 = arith.constant 3 : index
    %c0_24 = arith.constant 0 : index
    %c0_25 = arith.constant 0 : index
    %69 = vector.load %arg2[%c3, %c0_24, %c0_25] : memref<27x16x16xbf16, #tpu.memory_space<vmem>>, vector<1x16x16xbf16>
    %70 = vector.shape_cast %69 : vector<1x16x16xbf16> to vector<16x16xbf16>
    %71 = arith.truncf %68 : vector<16x256xf32> to vector<16x256xbf16>
    %cst_26 = arith.constant dense<0.000000e+00> : vector<16x256xf32>
    %72 = tpu.matmul %70, %71, %cst_26 {dimension_numbers = #tpu.dot_dimension_numbers<[1], [0], [0], [1], [0, 0, 1, 1], [], []>} : vector<16x16xbf16>, vector<16x256xbf16>, vector<16x256xf32> -> vector<16x256xf32>
    %73 = arith.addf %65, %72 : vector<16x256xf32>
    %c4 = arith.constant 4 : index
    %c0_27 = arith.constant 0 : index
    %c0_28 = arith.constant 0 : index
    %74 = vector.load %arg2[%c4, %c0_27, %c0_28] : memref<27x16x16xbf16, #tpu.memory_space<vmem>>, vector<1x16x16xbf16>
    %75 = vector.shape_cast %74 : vector<1x16x16xbf16> to vector<16x16xbf16>
    %76 = arith.truncf %1 : vector<16x256xf32> to vector<16x256xbf16>
    %cst_29 = arith.constant dense<0.000000e+00> : vector<16x256xf32>
    %77 = tpu.matmul %75, %76, %cst_29 {dimension_numbers = #tpu.dot_dimension_numbers<[1], [0], [0], [1], [0, 0, 1, 1], [], []>} : vector<16x16xbf16>, vector<16x256xbf16>, vector<16x256xf32> -> vector<16x256xf32>
    %78 = arith.addf %73, %77 : vector<16x256xf32>
    %c255_i32 = arith.constant 255 : i32
    %79 = tpu.dynamic_rotate %1 by %c255_i32 dim 1 : vector<16x256xf32>, i32 -> vector<16x256xf32>
    %80 = vector.broadcast %34 : vector<1x256xf32> to vector<16x256xf32>
    %81 = arith.mulf %79, %80 : vector<16x256xf32>
    %c5 = arith.constant 5 : index
    %c0_30 = arith.constant 0 : index
    %c0_31 = arith.constant 0 : index
    %82 = vector.load %arg2[%c5, %c0_30, %c0_31] : memref<27x16x16xbf16, #tpu.memory_space<vmem>>, vector<1x16x16xbf16>
    %83 = vector.shape_cast %82 : vector<1x16x16xbf16> to vector<16x16xbf16>
    %84 = arith.truncf %81 : vector<16x256xf32> to vector<16x256xbf16>
    %cst_32 = arith.constant dense<0.000000e+00> : vector<16x256xf32>
    %85 = tpu.matmul %83, %84, %cst_32 {dimension_numbers = #tpu.dot_dimension_numbers<[1], [0], [0], [1], [0, 0, 1, 1], [], []>} : vector<16x16xbf16>, vector<16x256xbf16>, vector<16x256xf32> -> vector<16x256xf32>
    %86 = arith.addf %78, %85 : vector<16x256xf32>
    %c241_i32 = arith.constant 241 : i32
    %87 = tpu.dynamic_rotate %1 by %c241_i32 dim 1 : vector<16x256xf32>, i32 -> vector<16x256xf32>
    %88 = vector.broadcast %37 : vector<1x256xf32> to vector<16x256xf32>
    %89 = arith.mulf %87, %88 : vector<16x256xf32>
    %c6 = arith.constant 6 : index
    %c0_33 = arith.constant 0 : index
    %c0_34 = arith.constant 0 : index
    %90 = vector.load %arg2[%c6, %c0_33, %c0_34] : memref<27x16x16xbf16, #tpu.memory_space<vmem>>, vector<1x16x16xbf16>
    %91 = vector.shape_cast %90 : vector<1x16x16xbf16> to vector<16x16xbf16>
    %92 = arith.truncf %89 : vector<16x256xf32> to vector<16x256xbf16>
    %cst_35 = arith.constant dense<0.000000e+00> : vector<16x256xf32>
    %93 = tpu.matmul %91, %92, %cst_35 {dimension_numbers = #tpu.dot_dimension_numbers<[1], [0], [0], [1], [0, 0, 1, 1], [], []>} : vector<16x16xbf16>, vector<16x256xbf16>, vector<16x256xf32> -> vector<16x256xf32>
    %94 = arith.addf %86, %93 : vector<16x256xf32>
    %c240_i32 = arith.constant 240 : i32
    %95 = tpu.dynamic_rotate %1 by %c240_i32 dim 1 : vector<16x256xf32>, i32 -> vector<16x256xf32>
    %96 = vector.broadcast %39 : vector<1x256xf32> to vector<16x256xf32>
    %97 = arith.mulf %95, %96 : vector<16x256xf32>
    %c7 = arith.constant 7 : index
    %c0_36 = arith.constant 0 : index
    %c0_37 = arith.constant 0 : index
    %98 = vector.load %arg2[%c7, %c0_36, %c0_37] : memref<27x16x16xbf16, #tpu.memory_space<vmem>>, vector<1x16x16xbf16>
    %99 = vector.shape_cast %98 : vector<1x16x16xbf16> to vector<16x16xbf16>
    %100 = arith.truncf %97 : vector<16x256xf32> to vector<16x256xbf16>
    %cst_38 = arith.constant dense<0.000000e+00> : vector<16x256xf32>
    %101 = tpu.matmul %99, %100, %cst_38 {dimension_numbers = #tpu.dot_dimension_numbers<[1], [0], [0], [1], [0, 0, 1, 1], [], []>} : vector<16x16xbf16>, vector<16x256xbf16>, vector<16x256xf32> -> vector<16x256xf32>
    %102 = arith.addf %94, %101 : vector<16x256xf32>
    %c239_i32 = arith.constant 239 : i32
    %103 = tpu.dynamic_rotate %1 by %c239_i32 dim 1 : vector<16x256xf32>, i32 -> vector<16x256xf32>
    %104 = vector.broadcast %42 : vector<1x256xf32> to vector<16x256xf32>
    %105 = arith.mulf %103, %104 : vector<16x256xf32>
    %c8 = arith.constant 8 : index
    %c0_39 = arith.constant 0 : index
    %c0_40 = arith.constant 0 : index
    %106 = vector.load %arg2[%c8, %c0_39, %c0_40] : memref<27x16x16xbf16, #tpu.memory_space<vmem>>, vector<1x16x16xbf16>
    %107 = vector.shape_cast %106 : vector<1x16x16xbf16> to vector<16x16xbf16>
    %108 = arith.truncf %105 : vector<16x256xf32> to vector<16x256xbf16>
    %cst_41 = arith.constant dense<0.000000e+00> : vector<16x256xf32>
    %109 = tpu.matmul %107, %108, %cst_41 {dimension_numbers = #tpu.dot_dimension_numbers<[1], [0], [0], [1], [0, 0, 1, 1], [], []>} : vector<16x16xbf16>, vector<16x256xbf16>, vector<16x256xf32> -> vector<16x256xf32>
    %110 = arith.addf %102, %109 : vector<16x256xf32>
    %111 = vector.broadcast %6 : vector<16x1xf32> to vector<16x256xf32>
    %112 = arith.addf %110, %111 : vector<16x256xf32>
    %cst_42 = arith.constant 0.000000e+00 : f32
    %113 = vector.broadcast %cst_42 : f32 to vector<16x256xf32>
    %114 = arith.maximumf %112, %113 : vector<16x256xf32>
    %c17_i32_43 = arith.constant 17 : i32
    %115 = tpu.dynamic_rotate %114 by %c17_i32_43 dim 1 : vector<16x256xf32>, i32 -> vector<16x256xf32>
    %116 = vector.broadcast %25 : vector<1x256xf32> to vector<16x256xf32>
    %117 = arith.mulf %115, %116 : vector<16x256xf32>
    %c9 = arith.constant 9 : index
    %c0_44 = arith.constant 0 : index
    %c0_45 = arith.constant 0 : index
    %118 = vector.load %arg2[%c9, %c0_44, %c0_45] : memref<27x16x16xbf16, #tpu.memory_space<vmem>>, vector<1x16x16xbf16>
    %119 = vector.shape_cast %118 : vector<1x16x16xbf16> to vector<16x16xbf16>
    %120 = arith.truncf %117 : vector<16x256xf32> to vector<16x256xbf16>
    %cst_46 = arith.constant dense<0.000000e+00> : vector<16x256xf32>
    %121 = tpu.matmul %119, %120, %cst_46 {dimension_numbers = #tpu.dot_dimension_numbers<[1], [0], [0], [1], [0, 0, 1, 1], [], []>} : vector<16x16xbf16>, vector<16x256xbf16>, vector<16x256xf32> -> vector<16x256xf32>
    %c16_i32_47 = arith.constant 16 : i32
    %122 = tpu.dynamic_rotate %114 by %c16_i32_47 dim 1 : vector<16x256xf32>, i32 -> vector<16x256xf32>
    %123 = vector.broadcast %27 : vector<1x256xf32> to vector<16x256xf32>
    %124 = arith.mulf %122, %123 : vector<16x256xf32>
    %c10 = arith.constant 10 : index
    %c0_48 = arith.constant 0 : index
    %c0_49 = arith.constant 0 : index
    %125 = vector.load %arg2[%c10, %c0_48, %c0_49] : memref<27x16x16xbf16, #tpu.memory_space<vmem>>, vector<1x16x16xbf16>
    %126 = vector.shape_cast %125 : vector<1x16x16xbf16> to vector<16x16xbf16>
    %127 = arith.truncf %124 : vector<16x256xf32> to vector<16x256xbf16>
    %cst_50 = arith.constant dense<0.000000e+00> : vector<16x256xf32>
    %128 = tpu.matmul %126, %127, %cst_50 {dimension_numbers = #tpu.dot_dimension_numbers<[1], [0], [0], [1], [0, 0, 1, 1], [], []>} : vector<16x16xbf16>, vector<16x256xbf16>, vector<16x256xf32> -> vector<16x256xf32>
    %129 = arith.addf %121, %128 : vector<16x256xf32>
    %c15_i32_51 = arith.constant 15 : i32
    %130 = tpu.dynamic_rotate %114 by %c15_i32_51 dim 1 : vector<16x256xf32>, i32 -> vector<16x256xf32>
    %131 = vector.broadcast %30 : vector<1x256xf32> to vector<16x256xf32>
    %132 = arith.mulf %130, %131 : vector<16x256xf32>
    %c11 = arith.constant 11 : index
    %c0_52 = arith.constant 0 : index
    %c0_53 = arith.constant 0 : index
    %133 = vector.load %arg2[%c11, %c0_52, %c0_53] : memref<27x16x16xbf16, #tpu.memory_space<vmem>>, vector<1x16x16xbf16>
    %134 = vector.shape_cast %133 : vector<1x16x16xbf16> to vector<16x16xbf16>
    %135 = arith.truncf %132 : vector<16x256xf32> to vector<16x256xbf16>
    %cst_54 = arith.constant dense<0.000000e+00> : vector<16x256xf32>
    %136 = tpu.matmul %134, %135, %cst_54 {dimension_numbers = #tpu.dot_dimension_numbers<[1], [0], [0], [1], [0, 0, 1, 1], [], []>} : vector<16x16xbf16>, vector<16x256xbf16>, vector<16x256xf32> -> vector<16x256xf32>
    %137 = arith.addf %129, %136 : vector<16x256xf32>
    %c1_i32_55 = arith.constant 1 : i32
    %138 = tpu.dynamic_rotate %114 by %c1_i32_55 dim 1 : vector<16x256xf32>, i32 -> vector<16x256xf32>
    %139 = vector.broadcast %32 : vector<1x256xf32> to vector<16x256xf32>
    %140 = arith.mulf %138, %139 : vector<16x256xf32>
    %c12 = arith.constant 12 : index
    %c0_56 = arith.constant 0 : index
    %c0_57 = arith.constant 0 : index
    %141 = vector.load %arg2[%c12, %c0_56, %c0_57] : memref<27x16x16xbf16, #tpu.memory_space<vmem>>, vector<1x16x16xbf16>
    %142 = vector.shape_cast %141 : vector<1x16x16xbf16> to vector<16x16xbf16>
    %143 = arith.truncf %140 : vector<16x256xf32> to vector<16x256xbf16>
    %cst_58 = arith.constant dense<0.000000e+00> : vector<16x256xf32>
    %144 = tpu.matmul %142, %143, %cst_58 {dimension_numbers = #tpu.dot_dimension_numbers<[1], [0], [0], [1], [0, 0, 1, 1], [], []>} : vector<16x16xbf16>, vector<16x256xbf16>, vector<16x256xf32> -> vector<16x256xf32>
    %145 = arith.addf %137, %144 : vector<16x256xf32>
    %c13 = arith.constant 13 : index
    %c0_59 = arith.constant 0 : index
    %c0_60 = arith.constant 0 : index
    %146 = vector.load %arg2[%c13, %c0_59, %c0_60] : memref<27x16x16xbf16, #tpu.memory_space<vmem>>, vector<1x16x16xbf16>
    %147 = vector.shape_cast %146 : vector<1x16x16xbf16> to vector<16x16xbf16>
    %148 = arith.truncf %114 : vector<16x256xf32> to vector<16x256xbf16>
    %cst_61 = arith.constant dense<0.000000e+00> : vector<16x256xf32>
    %149 = tpu.matmul %147, %148, %cst_61 {dimension_numbers = #tpu.dot_dimension_numbers<[1], [0], [0], [1], [0, 0, 1, 1], [], []>} : vector<16x16xbf16>, vector<16x256xbf16>, vector<16x256xf32> -> vector<16x256xf32>
    %150 = arith.addf %145, %149 : vector<16x256xf32>
    %c255_i32_62 = arith.constant 255 : i32
    %151 = tpu.dynamic_rotate %114 by %c255_i32_62 dim 1 : vector<16x256xf32>, i32 -> vector<16x256xf32>
    %152 = vector.broadcast %34 : vector<1x256xf32> to vector<16x256xf32>
    %153 = arith.mulf %151, %152 : vector<16x256xf32>
    %c14 = arith.constant 14 : index
    %c0_63 = arith.constant 0 : index
    %c0_64 = arith.constant 0 : index
    %154 = vector.load %arg2[%c14, %c0_63, %c0_64] : memref<27x16x16xbf16, #tpu.memory_space<vmem>>, vector<1x16x16xbf16>
    %155 = vector.shape_cast %154 : vector<1x16x16xbf16> to vector<16x16xbf16>
    %156 = arith.truncf %153 : vector<16x256xf32> to vector<16x256xbf16>
    %cst_65 = arith.constant dense<0.000000e+00> : vector<16x256xf32>
    %157 = tpu.matmul %155, %156, %cst_65 {dimension_numbers = #tpu.dot_dimension_numbers<[1], [0], [0], [1], [0, 0, 1, 1], [], []>} : vector<16x16xbf16>, vector<16x256xbf16>, vector<16x256xf32> -> vector<16x256xf32>
    %158 = arith.addf %150, %157 : vector<16x256xf32>
    %c241_i32_66 = arith.constant 241 : i32
    %159 = tpu.dynamic_rotate %114 by %c241_i32_66 dim 1 : vector<16x256xf32>, i32 -> vector<16x256xf32>
    %160 = vector.broadcast %37 : vector<1x256xf32> to vector<16x256xf32>
    %161 = arith.mulf %159, %160 : vector<16x256xf32>
    %c15 = arith.constant 15 : index
    %c0_67 = arith.constant 0 : index
    %c0_68 = arith.constant 0 : index
    %162 = vector.load %arg2[%c15, %c0_67, %c0_68] : memref<27x16x16xbf16, #tpu.memory_space<vmem>>, vector<1x16x16xbf16>
    %163 = vector.shape_cast %162 : vector<1x16x16xbf16> to vector<16x16xbf16>
    %164 = arith.truncf %161 : vector<16x256xf32> to vector<16x256xbf16>
    %cst_69 = arith.constant dense<0.000000e+00> : vector<16x256xf32>
    %165 = tpu.matmul %163, %164, %cst_69 {dimension_numbers = #tpu.dot_dimension_numbers<[1], [0], [0], [1], [0, 0, 1, 1], [], []>} : vector<16x16xbf16>, vector<16x256xbf16>, vector<16x256xf32> -> vector<16x256xf32>
    %166 = arith.addf %158, %165 : vector<16x256xf32>
    %c240_i32_70 = arith.constant 240 : i32
    %167 = tpu.dynamic_rotate %114 by %c240_i32_70 dim 1 : vector<16x256xf32>, i32 -> vector<16x256xf32>
    %168 = vector.broadcast %39 : vector<1x256xf32> to vector<16x256xf32>
    %169 = arith.mulf %167, %168 : vector<16x256xf32>
    %c16_71 = arith.constant 16 : index
    %c0_72 = arith.constant 0 : index
    %c0_73 = arith.constant 0 : index
    %170 = vector.load %arg2[%c16_71, %c0_72, %c0_73] : memref<27x16x16xbf16, #tpu.memory_space<vmem>>, vector<1x16x16xbf16>
    %171 = vector.shape_cast %170 : vector<1x16x16xbf16> to vector<16x16xbf16>
    %172 = arith.truncf %169 : vector<16x256xf32> to vector<16x256xbf16>
    %cst_74 = arith.constant dense<0.000000e+00> : vector<16x256xf32>
    %173 = tpu.matmul %171, %172, %cst_74 {dimension_numbers = #tpu.dot_dimension_numbers<[1], [0], [0], [1], [0, 0, 1, 1], [], []>} : vector<16x16xbf16>, vector<16x256xbf16>, vector<16x256xf32> -> vector<16x256xf32>
    %174 = arith.addf %166, %173 : vector<16x256xf32>
    %c239_i32_75 = arith.constant 239 : i32
    %175 = tpu.dynamic_rotate %114 by %c239_i32_75 dim 1 : vector<16x256xf32>, i32 -> vector<16x256xf32>
    %176 = vector.broadcast %42 : vector<1x256xf32> to vector<16x256xf32>
    %177 = arith.mulf %175, %176 : vector<16x256xf32>
    %c17 = arith.constant 17 : index
    %c0_76 = arith.constant 0 : index
    %c0_77 = arith.constant 0 : index
    %178 = vector.load %arg2[%c17, %c0_76, %c0_77] : memref<27x16x16xbf16, #tpu.memory_space<vmem>>, vector<1x16x16xbf16>
    %179 = vector.shape_cast %178 : vector<1x16x16xbf16> to vector<16x16xbf16>
    %180 = arith.truncf %177 : vector<16x256xf32> to vector<16x256xbf16>
    %cst_78 = arith.constant dense<0.000000e+00> : vector<16x256xf32>
    %181 = tpu.matmul %179, %180, %cst_78 {dimension_numbers = #tpu.dot_dimension_numbers<[1], [0], [0], [1], [0, 0, 1, 1], [], []>} : vector<16x16xbf16>, vector<16x256xbf16>, vector<16x256xf32> -> vector<16x256xf32>
    %182 = arith.addf %174, %181 : vector<16x256xf32>
    %183 = vector.broadcast %7 : vector<16x1xf32> to vector<16x256xf32>
    %184 = arith.addf %182, %183 : vector<16x256xf32>
    %cst_79 = arith.constant 0.000000e+00 : f32
    %185 = vector.broadcast %cst_79 : f32 to vector<16x256xf32>
    %186 = arith.cmpf ogt, %184, %185 : vector<16x256xf32>
    %cst_80 = arith.constant 1.000000e-01 : f32
    %187 = vector.broadcast %cst_80 : f32 to vector<16x256xf32>
    %188 = arith.mulf %187, %184 : vector<16x256xf32>
    %189 = arith.select %186, %184, %188 : vector<16x256xi1>, vector<16x256xf32>
    %c17_i32_81 = arith.constant 17 : i32
    %190 = tpu.dynamic_rotate %189 by %c17_i32_81 dim 1 : vector<16x256xf32>, i32 -> vector<16x256xf32>
    %191 = vector.broadcast %25 : vector<1x256xf32> to vector<16x256xf32>
    %192 = arith.mulf %190, %191 : vector<16x256xf32>
    %c18 = arith.constant 18 : index
    %c0_82 = arith.constant 0 : index
    %c0_83 = arith.constant 0 : index
    %193 = vector.load %arg2[%c18, %c0_82, %c0_83] : memref<27x16x16xbf16, #tpu.memory_space<vmem>>, vector<1x16x16xbf16>
    %194 = vector.shape_cast %193 : vector<1x16x16xbf16> to vector<16x16xbf16>
    %195 = arith.truncf %192 : vector<16x256xf32> to vector<16x256xbf16>
    %cst_84 = arith.constant dense<0.000000e+00> : vector<16x256xf32>
    %196 = tpu.matmul %194, %195, %cst_84 {dimension_numbers = #tpu.dot_dimension_numbers<[1], [0], [0], [1], [0, 0, 1, 1], [], []>} : vector<16x16xbf16>, vector<16x256xbf16>, vector<16x256xf32> -> vector<16x256xf32>
    %c16_i32_85 = arith.constant 16 : i32
    %197 = tpu.dynamic_rotate %189 by %c16_i32_85 dim 1 : vector<16x256xf32>, i32 -> vector<16x256xf32>
    %198 = vector.broadcast %27 : vector<1x256xf32> to vector<16x256xf32>
    %199 = arith.mulf %197, %198 : vector<16x256xf32>
    %c19 = arith.constant 19 : index
    %c0_86 = arith.constant 0 : index
    %c0_87 = arith.constant 0 : index
    %200 = vector.load %arg2[%c19, %c0_86, %c0_87] : memref<27x16x16xbf16, #tpu.memory_space<vmem>>, vector<1x16x16xbf16>
    %201 = vector.shape_cast %200 : vector<1x16x16xbf16> to vector<16x16xbf16>
    %202 = arith.truncf %199 : vector<16x256xf32> to vector<16x256xbf16>
    %cst_88 = arith.constant dense<0.000000e+00> : vector<16x256xf32>
    %203 = tpu.matmul %201, %202, %cst_88 {dimension_numbers = #tpu.dot_dimension_numbers<[1], [0], [0], [1], [0, 0, 1, 1], [], []>} : vector<16x16xbf16>, vector<16x256xbf16>, vector<16x256xf32> -> vector<16x256xf32>
    %204 = arith.addf %196, %203 : vector<16x256xf32>
    %c15_i32_89 = arith.constant 15 : i32
    %205 = tpu.dynamic_rotate %189 by %c15_i32_89 dim 1 : vector<16x256xf32>, i32 -> vector<16x256xf32>
    %206 = vector.broadcast %30 : vector<1x256xf32> to vector<16x256xf32>
    %207 = arith.mulf %205, %206 : vector<16x256xf32>
    %c20 = arith.constant 20 : index
    %c0_90 = arith.constant 0 : index
    %c0_91 = arith.constant 0 : index
    %208 = vector.load %arg2[%c20, %c0_90, %c0_91] : memref<27x16x16xbf16, #tpu.memory_space<vmem>>, vector<1x16x16xbf16>
    %209 = vector.shape_cast %208 : vector<1x16x16xbf16> to vector<16x16xbf16>
    %210 = arith.truncf %207 : vector<16x256xf32> to vector<16x256xbf16>
    %cst_92 = arith.constant dense<0.000000e+00> : vector<16x256xf32>
    %211 = tpu.matmul %209, %210, %cst_92 {dimension_numbers = #tpu.dot_dimension_numbers<[1], [0], [0], [1], [0, 0, 1, 1], [], []>} : vector<16x16xbf16>, vector<16x256xbf16>, vector<16x256xf32> -> vector<16x256xf32>
    %212 = arith.addf %204, %211 : vector<16x256xf32>
    %c1_i32_93 = arith.constant 1 : i32
    %213 = tpu.dynamic_rotate %189 by %c1_i32_93 dim 1 : vector<16x256xf32>, i32 -> vector<16x256xf32>
    %214 = vector.broadcast %32 : vector<1x256xf32> to vector<16x256xf32>
    %215 = arith.mulf %213, %214 : vector<16x256xf32>
    %c21 = arith.constant 21 : index
    %c0_94 = arith.constant 0 : index
    %c0_95 = arith.constant 0 : index
    %216 = vector.load %arg2[%c21, %c0_94, %c0_95] : memref<27x16x16xbf16, #tpu.memory_space<vmem>>, vector<1x16x16xbf16>
    %217 = vector.shape_cast %216 : vector<1x16x16xbf16> to vector<16x16xbf16>
    %218 = arith.truncf %215 : vector<16x256xf32> to vector<16x256xbf16>
    %cst_96 = arith.constant dense<0.000000e+00> : vector<16x256xf32>
    %219 = tpu.matmul %217, %218, %cst_96 {dimension_numbers = #tpu.dot_dimension_numbers<[1], [0], [0], [1], [0, 0, 1, 1], [], []>} : vector<16x16xbf16>, vector<16x256xbf16>, vector<16x256xf32> -> vector<16x256xf32>
    %220 = arith.addf %212, %219 : vector<16x256xf32>
    %c22 = arith.constant 22 : index
    %c0_97 = arith.constant 0 : index
    %c0_98 = arith.constant 0 : index
    %221 = vector.load %arg2[%c22, %c0_97, %c0_98] : memref<27x16x16xbf16, #tpu.memory_space<vmem>>, vector<1x16x16xbf16>
    %222 = vector.shape_cast %221 : vector<1x16x16xbf16> to vector<16x16xbf16>
    %223 = arith.truncf %189 : vector<16x256xf32> to vector<16x256xbf16>
    %cst_99 = arith.constant dense<0.000000e+00> : vector<16x256xf32>
    %224 = tpu.matmul %222, %223, %cst_99 {dimension_numbers = #tpu.dot_dimension_numbers<[1], [0], [0], [1], [0, 0, 1, 1], [], []>} : vector<16x16xbf16>, vector<16x256xbf16>, vector<16x256xf32> -> vector<16x256xf32>
    %225 = arith.addf %220, %224 : vector<16x256xf32>
    %c255_i32_100 = arith.constant 255 : i32
    %226 = tpu.dynamic_rotate %189 by %c255_i32_100 dim 1 : vector<16x256xf32>, i32 -> vector<16x256xf32>
    %227 = vector.broadcast %34 : vector<1x256xf32> to vector<16x256xf32>
    %228 = arith.mulf %226, %227 : vector<16x256xf32>
    %c23 = arith.constant 23 : index
    %c0_101 = arith.constant 0 : index
    %c0_102 = arith.constant 0 : index
    %229 = vector.load %arg2[%c23, %c0_101, %c0_102] : memref<27x16x16xbf16, #tpu.memory_space<vmem>>, vector<1x16x16xbf16>
    %230 = vector.shape_cast %229 : vector<1x16x16xbf16> to vector<16x16xbf16>
    %231 = arith.truncf %228 : vector<16x256xf32> to vector<16x256xbf16>
    %cst_103 = arith.constant dense<0.000000e+00> : vector<16x256xf32>
    %232 = tpu.matmul %230, %231, %cst_103 {dimension_numbers = #tpu.dot_dimension_numbers<[1], [0], [0], [1], [0, 0, 1, 1], [], []>} : vector<16x16xbf16>, vector<16x256xbf16>, vector<16x256xf32> -> vector<16x256xf32>
    %233 = arith.addf %225, %232 : vector<16x256xf32>
    %c241_i32_104 = arith.constant 241 : i32
    %234 = tpu.dynamic_rotate %189 by %c241_i32_104 dim 1 : vector<16x256xf32>, i32 -> vector<16x256xf32>
    %235 = vector.broadcast %37 : vector<1x256xf32> to vector<16x256xf32>
    %236 = arith.mulf %234, %235 : vector<16x256xf32>
    %c24 = arith.constant 24 : index
    %c0_105 = arith.constant 0 : index
    %c0_106 = arith.constant 0 : index
    %237 = vector.load %arg2[%c24, %c0_105, %c0_106] : memref<27x16x16xbf16, #tpu.memory_space<vmem>>, vector<1x16x16xbf16>
    %238 = vector.shape_cast %237 : vector<1x16x16xbf16> to vector<16x16xbf16>
    %239 = arith.truncf %236 : vector<16x256xf32> to vector<16x256xbf16>
    %cst_107 = arith.constant dense<0.000000e+00> : vector<16x256xf32>
    %240 = tpu.matmul %238, %239, %cst_107 {dimension_numbers = #tpu.dot_dimension_numbers<[1], [0], [0], [1], [0, 0, 1, 1], [], []>} : vector<16x16xbf16>, vector<16x256xbf16>, vector<16x256xf32> -> vector<16x256xf32>
    %241 = arith.addf %233, %240 : vector<16x256xf32>
    %c240_i32_108 = arith.constant 240 : i32
    %242 = tpu.dynamic_rotate %189 by %c240_i32_108 dim 1 : vector<16x256xf32>, i32 -> vector<16x256xf32>
    %243 = vector.broadcast %39 : vector<1x256xf32> to vector<16x256xf32>
    %244 = arith.mulf %242, %243 : vector<16x256xf32>
    %c25 = arith.constant 25 : index
    %c0_109 = arith.constant 0 : index
    %c0_110 = arith.constant 0 : index
    %245 = vector.load %arg2[%c25, %c0_109, %c0_110] : memref<27x16x16xbf16, #tpu.memory_space<vmem>>, vector<1x16x16xbf16>
    %246 = vector.shape_cast %245 : vector<1x16x16xbf16> to vector<16x16xbf16>
    %247 = arith.truncf %244 : vector<16x256xf32> to vector<16x256xbf16>
    %cst_111 = arith.constant dense<0.000000e+00> : vector<16x256xf32>
    %248 = tpu.matmul %246, %247, %cst_111 {dimension_numbers = #tpu.dot_dimension_numbers<[1], [0], [0], [1], [0, 0, 1, 1], [], []>} : vector<16x16xbf16>, vector<16x256xbf16>, vector<16x256xf32> -> vector<16x256xf32>
    %249 = arith.addf %241, %248 : vector<16x256xf32>
    %c239_i32_112 = arith.constant 239 : i32
    %250 = tpu.dynamic_rotate %189 by %c239_i32_112 dim 1 : vector<16x256xf32>, i32 -> vector<16x256xf32>
    %251 = vector.broadcast %42 : vector<1x256xf32> to vector<16x256xf32>
    %252 = arith.mulf %250, %251 : vector<16x256xf32>
    %c26 = arith.constant 26 : index
    %c0_113 = arith.constant 0 : index
    %c0_114 = arith.constant 0 : index
    %253 = vector.load %arg2[%c26, %c0_113, %c0_114] : memref<27x16x16xbf16, #tpu.memory_space<vmem>>, vector<1x16x16xbf16>
    %254 = vector.shape_cast %253 : vector<1x16x16xbf16> to vector<16x16xbf16>
    %255 = arith.truncf %252 : vector<16x256xf32> to vector<16x256xbf16>
    %cst_115 = arith.constant dense<0.000000e+00> : vector<16x256xf32>
    %256 = tpu.matmul %254, %255, %cst_115 {dimension_numbers = #tpu.dot_dimension_numbers<[1], [0], [0], [1], [0, 0, 1, 1], [], []>} : vector<16x16xbf16>, vector<16x256xbf16>, vector<16x256xf32> -> vector<16x256xf32>
    %257 = arith.addf %249, %256 : vector<16x256xf32>
    %258 = vector.broadcast %8 : vector<16x1xf32> to vector<16x256xf32>
    %259 = arith.addf %257, %258 : vector<16x256xf32>
    %260 = arith.addf %259, %114 : vector<16x256xf32>
    %cst_116 = arith.constant dense<0.000000e+00> : vector<8x256xf32>
    %261 = tpu.matmul %2, %114, %cst_116 {dimension_numbers = #tpu.dot_dimension_numbers<[1], [0], [0], [1], [0, 0, 1, 1], [], []>} : vector<8x16xf32>, vector<16x256xf32>, vector<8x256xf32> -> vector<8x256xf32>
    %cst_117 = arith.constant 0.000000e+00 : f32
    %262 = vector.broadcast %cst_117 : f32 to vector<8x256xf32>
    %263 = arith.maximumf %261, %262 : vector<8x256xf32>
    %264 = arith.truncf %263 : vector<8x256xf32> to vector<8x256xbf16>
    %c0_118 = arith.constant 0 : index
    %c0_119 = arith.constant 0 : index
    %c0_120 = arith.constant 0 : index
    %265 = vector.load %arg4[%c0_118, %c0_119, %c0_120] : memref<2x256x144xbf16, #tpu.memory_space<vmem>>, vector<1x256x144xbf16>
    %266 = vector.shape_cast %265 : vector<1x256x144xbf16> to vector<256x144xbf16>
    %cst_121 = arith.constant dense<0.000000e+00> : vector<8x144xf32>
    %267 = tpu.matmul %264, %266, %cst_121 {dimension_numbers = #tpu.dot_dimension_numbers<[1], [0], [0], [1], [0, 0, 1, 1], [], []>} : vector<8x256xbf16>, vector<256x144xbf16>, vector<8x144xf32> -> vector<8x144xf32>
    %c1_122 = arith.constant 1 : index
    %c0_123 = arith.constant 0 : index
    %c0_124 = arith.constant 0 : index
    %268 = vector.load %arg4[%c1_122, %c0_123, %c0_124] : memref<2x256x144xbf16, #tpu.memory_space<vmem>>, vector<1x256x144xbf16>
    %269 = vector.shape_cast %268 : vector<1x256x144xbf16> to vector<256x144xbf16>
    %cst_125 = arith.constant dense<0.000000e+00> : vector<8x144xf32>
    %270 = tpu.matmul %264, %269, %cst_125 {dimension_numbers = #tpu.dot_dimension_numbers<[1], [0], [0], [1], [0, 0, 1, 1], [], []>} : vector<8x256xbf16>, vector<256x144xbf16>, vector<8x144xf32> -> vector<8x144xf32>
    %271 = tpu.concatenate %267, %270 in 0 : vector<8x144xf32>, vector<8x144xf32> -> vector<16x144xf32>
    %cst_126 = arith.constant dense<0.000000e+00> : vector<16x144xf32>
    %272 = tpu.matmul %3, %271, %cst_126 {dimension_numbers = #tpu.dot_dimension_numbers<[1], [0], [0], [1], [0, 0, 1, 1], [], []>} : vector<16x16xf32>, vector<16x144xf32>, vector<16x144xf32> -> vector<16x144xf32>
    %cst_127 = arith.constant 0.000000e+00 : f32
    %273 = vector.broadcast %cst_127 : f32 to vector<16x144xf32>
    %274 = arith.maximumf %272, %273 : vector<16x144xf32>
    %275 = vector.extract_strided_slice %274 {offsets = [0, 0], sizes = [8, 144], strides = [1, 1]} : vector<16x144xf32> to vector<8x144xf32>
    %276 = arith.truncf %275 : vector<8x144xf32> to vector<8x144xbf16>
    %c0_128 = arith.constant 0 : index
    %c0_129 = arith.constant 0 : index
    %c0_130 = arith.constant 0 : index
    %277 = vector.load %arg5[%c0_128, %c0_129, %c0_130] : memref<2x144x256xbf16, #tpu.memory_space<vmem>>, vector<1x144x256xbf16>
    %278 = vector.shape_cast %277 : vector<1x144x256xbf16> to vector<144x256xbf16>
    %cst_131 = arith.constant dense<0.000000e+00> : vector<8x256xf32>
    %279 = tpu.matmul %276, %278, %cst_131 {dimension_numbers = #tpu.dot_dimension_numbers<[1], [0], [0], [1], [0, 0, 1, 1], [], []>} : vector<8x144xbf16>, vector<144x256xbf16>, vector<8x256xf32> -> vector<8x256xf32>
    %280 = vector.extract_strided_slice %274 {offsets = [8, 0], sizes = [8, 144], strides = [1, 1]} : vector<16x144xf32> to vector<8x144xf32>
    %281 = arith.truncf %280 : vector<8x144xf32> to vector<8x144xbf16>
    %c1_132 = arith.constant 1 : index
    %c0_133 = arith.constant 0 : index
    %c0_134 = arith.constant 0 : index
    %282 = vector.load %arg5[%c1_132, %c0_133, %c0_134] : memref<2x144x256xbf16, #tpu.memory_space<vmem>>, vector<1x144x256xbf16>
    %283 = vector.shape_cast %282 : vector<1x144x256xbf16> to vector<144x256xbf16>
    %cst_135 = arith.constant dense<0.000000e+00> : vector<8x256xf32>
    %284 = tpu.matmul %281, %283, %cst_135 {dimension_numbers = #tpu.dot_dimension_numbers<[1], [0], [0], [1], [0, 0, 1, 1], [], []>} : vector<8x144xbf16>, vector<144x256xbf16>, vector<8x256xf32> -> vector<8x256xf32>
    %285 = arith.addf %279, %284 : vector<8x256xf32>
    %286 = arith.addf %263, %285 : vector<8x256xf32>
    %cst_136 = arith.constant dense<0.000000e+00> : vector<16x256xf32>
    %287 = tpu.matmul %4, %286, %cst_136 {dimension_numbers = #tpu.dot_dimension_numbers<[1], [0], [0], [1], [0, 0, 1, 1], [], []>} : vector<16x8xf32>, vector<8x256xf32>, vector<16x256xf32> -> vector<16x256xf32>
    %288 = tpu.concatenate %260, %287 in 0 : vector<16x256xf32>, vector<16x256xf32> -> vector<32x256xf32>
    %cst_137 = arith.constant dense<0.000000e+00> : vector<16x256xf32>
    %289 = tpu.matmul %5, %288, %cst_137 {dimension_numbers = #tpu.dot_dimension_numbers<[1], [0], [0], [1], [0, 0, 1, 1], [], []>} : vector<16x32xf32>, vector<32x256xf32>, vector<16x256xf32> -> vector<16x256xf32>
    %290 = vector.broadcast %9 : vector<16x1xf32> to vector<16x256xf32>
    %291 = arith.addf %289, %290 : vector<16x256xf32>
    %c0_138 = arith.constant 0 : index
    %c0_139 = arith.constant 0 : index
    %c0_140 = arith.constant 0 : index
    %292 = vector.load %arg6[%c0_138, %c0_139, %c0_140] : memref<1x16x256xf32, #tpu.memory_space<vmem>>, vector<1x16x256xf32>
    %293 = vector.shape_cast %292 : vector<1x16x256xf32> to vector<16x256xf32>
    %294 = vector.shape_cast %291 : vector<16x256xf32> to vector<1x16x256xf32>
    tpu.vector_store %arg6[%c0_138, %c0_139, %c0_140], %294 {strides = array<i32>} : memref<1x16x256xf32, #tpu.memory_space<vmem>>, vector<1x16x256xf32>,
    return
  }
  func.func @transform_0(%arg0: i32) -> (i32, i32, i32) {
    %c0_i32 = arith.constant 0 : i32
    %c0_i32_0 = arith.constant 0 : i32
    %c0_i32_1 = arith.constant 0 : i32
    return %arg0, %c0_i32, %c0_i32_0 : i32, i32, i32
  }
  func.func @transform_1(%arg0: i32) -> (i32, i32, i32) {
    %c0_i32 = arith.constant 0 : i32
    %c0_i32_0 = arith.constant 0 : i32
    %c0_i32_1 = arith.constant 0 : i32
    %c0_i32_2 = arith.constant 0 : i32
    return %c0_i32, %c0_i32_0, %c0_i32_1 : i32, i32, i32
  }
  func.func @transform_2(%arg0: i32) -> (i32, i32) {
    %c0_i32 = arith.constant 0 : i32
    %c0_i32_0 = arith.constant 0 : i32
    %c0_i32_1 = arith.constant 0 : i32
    return %c0_i32, %c0_i32_0 : i32, i32
  }
  func.func @transform_3(%arg0: i32) -> (i32, i32, i32) {
    %c0_i32 = arith.constant 0 : i32
    %c0_i32_0 = arith.constant 0 : i32
    %c0_i32_1 = arith.constant 0 : i32
    %c0_i32_2 = arith.constant 0 : i32
    return %c0_i32, %c0_i32_0, %c0_i32_1 : i32, i32, i32
  }
  func.func @transform_4(%arg0: i32) -> (i32, i32, i32) {
    %c0_i32 = arith.constant 0 : i32
    %c0_i32_0 = arith.constant 0 : i32
    %c0_i32_1 = arith.constant 0 : i32
    %c0_i32_2 = arith.constant 0 : i32
    return %c0_i32, %c0_i32_0, %c0_i32_1 : i32, i32, i32
  }
  func.func @transform_5(%arg0: i32) -> (i32, i32, i32) {
    %c0_i32 = arith.constant 0 : i32
    %c0_i32_0 = arith.constant 0 : i32
    %c0_i32_1 = arith.constant 0 : i32
    return %arg0, %c0_i32, %c0_i32_0 : i32, i32, i32
  }
}

</mosaic_0001>

<bundles_post_ra>
// kernel: tpu_custom_call.1
= control target key start
LH: loop header
LB: loop body
LE: loop exit
PB: predicated region body
PF: predicated region fallthrough
CT: control target
= control target key end

     0   :  { %10 = vsyncpa [#allocation3], 0  ;;  %s5528_s0 = inlined_call_operand.vmem [shape: f32[2,16,256], index: 0, kind: input, shape index: {}]   ;;  %s5529_s1 = inlined_call_operand.vmem [shape: bf16[27,16,16], index: 1, kind: input, shape index: {}]   ;;  %s5530_s2 = inlined_call_operand.vmem [shape: f32[128,32], index: 2, kind: input, shape index: {}]   ;;  %s5531_s3 = inlined_call_operand.vmem [shape: bf16[2,256,144], index: 3, kind: input, shape index: {}]   ;;  %s5532_s4 = inlined_call_operand.vmem [shape: bf16[2,144,256], index: 4, kind: input, shape index: {}]   ;;  %s5533_s5 = inlined_call_operand.hbm [shape: f32[2,16,256], index: 5, kind: output, shape index: {}]  }
   0x1   :  { %12 = vsyncpa [#allocation3 + $0x1], 0  ;;  %s4185_s18 = smov 0   ;;  %s4187_s19 = smov 0  }
   0x2   :  { %s4189_s20 = smov 0   ;;  %s4191_s21 = smov 0  }
   0x3 LB: > { %s4206_s22 = sadd.s32 4294967295, %s4141_s21   ;;  %s3549_s23 = sadd.s32 4294967294, %s4141_s21   ;;  %s4141_s21 = sphi %s4191_s21, %s5555_s21   ;;  %s4137_s20 = sphi %s4189_s20, %s5554_s20   ;;  %s4133_s19 = sphi %s4187_s19, %s5553_s19   ;;  %s4129_s18 = sphi %s4185_s18, %s5552_s18  }
   0x4   : > { %s4210_s24 = sadd.s32 1, %s4141_s21   ;;  %s135_s25 = sadd.s32 1, %s4137_s20 }
   0x5   : > { %s132_s26 = ssub.s32 %s4141_s21, %s4210_s24  ;;  %p145_p0 = scmp.ne.s32.totalorder %s4137_s20, %s4133_s19 }
   0x6   : > { %p133_p1 = scmp.eq.s32.totalorder %s132_s26, 0  ;;  %p146_p2 = scmp.eq.s32.totalorder %s4206_s22, 1 }
   0x7   : > { %p151_p3 = scmp.ne.s32.totalorder %s4133_s19, %s4129_s18  ;;  %p152_p4 = scmp.eq.s32.totalorder %s3549_s23, 1 }
   0x8   : > { %s4221_s27 = scalar_select %p133_p1, %s4137_s20, %s135_s25  }
   0x9   : > { %p4223_p5 = por %p146_p2, %p145_p0  ;;  %p4227_p6 = por %p152_p4, %p151_p3 }
   0xa   : > { %p3552_p7 = scmp.ge.s32.totalorder %s4141_s21, 1  ;;  %p190_p8 = scmp.lt.s32.totalorder %s4141_s21, 3 }
   0xc   : > { %p191_p9 = pnand %p3552_p7, %p190_p8 }
   0xd   : > { %p218_p10 = scmp.lt.s32.totalorder (!%p191_p9), %s4206_s22, 1  ;;  %s4143_s10 = smov (!%p191_p9), 16  }
   0xe   : > { %194 = sbr.rel (%p191_p9) target bundleno = 2181 (0x885), region = 40  ;;  %s4144_s11 = smov (!%p191_p9), 17  }
   0xf   : > { %s4146_s12 = smov (!%p191_p9), 15   ;;  %s4147_s13 = smov (!%p191_p9), 1  }
  0x10   : > { %s4148_s14 = smov (!%p191_p9), 127   ;;  %s4149_s15 = smov (!%p191_p9), 113  }
  0x11   : > { %s4150_s16 = smov (!%p191_p9), 112   ;;  %s4151_s17 = smov (!%p191_p9), 111  }
  0x12   : > { %s4153_s8 = smov (!%p191_p9), [#allocation2]  }
  0x13   : > { %s219_s30 = scalar_select %p218_p10, %s4206_s22, 1  ;;  %v4145_v4 = vmov 0   ;;  %v235_v7 = vld [vmem:[%s5530_s2 + $0x40] sm:$0xff]  ;;  %v236_v8 = vld [vmem:[%s5530_s2 + $0x48] sm:$0xff]  ;;  %v243_v9 = vlaneseq  ;;  %v4152_v21 = vmov 0.0   ;;  %vm346_vm8 = vcmask 130048  }
  0x14   : > { %382 = vmatprep.mubr.bf16.mxu0 %v4145_v4  ;;  %433 = vmatprep.mubr.bf16.mxu1 %v4145_v4  ;;  %v3904_v39 = vld [vmem:[%s5529_s1 + $0x8] sm:$0xff]   ;;  %v3905_v58 = vld [vmem:[%s5529_s1] sm:$0xff]   ;;  %v3911_v44 = vld [vmem:[%s5529_s1 + $0x38] sm:$0xff]  }
  0x15   : > { %s3842_s6 = sshll.u32 %s219_s30, 5  ;;  %3902 = vset.pattern.permute.xlu0 %v4145_v4  ;;  %3903 = vset.pattern.permute.xlu1 %v4145_v4  ;;  %v4324_v10 = vand.u32 127, %v243_v9  ;;  %v3909_v27 = vld [vmem:[%s5529_s1 + $0x28] sm:$0xff]  }
  0x16   : > { %s222_s9 = scalar_lea.vmem %s5528_s0, %s3842_s6 }
  0x17   : > { %v4238_v0 = vld [vmem:[%s222_s9 + $0x8] sm:$0xff]  ;;  %v4240_v1 = vld [vmem:[%s222_s9] sm:$0xff]  ;;  %v4246_v2 = vld [vmem:[%s222_s9 + $0x18] sm:$0xff]  ;;  %v4327_v11 = vadd.s32 128, %v4324_v10  ;;  %v248_v13 = vshra.s32 %v4324_v10, 4  ;;  %vm327_vm0 = vcmp.lt.s32.totalorder %v4324_v10, 16 }
  0x18   : > { %323 = vrot.lane.b32.xlu1 %v4238_v0, %s4143_s10  ;;  %319 = vrot.lane.b32.xlu0 %v4240_v1, %s4143_s10  ;;  %v4248_v3 = vld [vmem:[%s222_s9 + $0x10] sm:$0xff]  ;;  %v602_v5 = vpack.c.bf16 %v4246_v2, %v4238_v0  ;;  %v246_v18 = vand.u32 15, %v4324_v10  ;;  %vm306_vm7 = vcmp.lt.s32.totalorder %v4324_v10, 17  ;;  %vm452_vm13 = vcmp.lt.s32.totalorder %v4324_v10, 15  ;;  %s4085_s9 = sshll.u32 %s4153_s8, 4  ;;  %s4086_s9 = int_to_ptr.vmem [resolvable:$false] %s4085_s9 }
  0x19   : > { %v601_v6 = vpack.c.bf16 %v4248_v3, %v4240_v1  ;;  %v249_v12 = vshra.s32 %v4327_v11, 4  ;;  %vm4340_vm2 = vcmp.ge.s32.totalorder %v248_v13, 1  ;;  %v247_v19 = vand.u32 15, %v4327_v11  ;;  %s4087_s23 = scalar_lea.vmem %s4086_s9, 1024 }
  0x1a   : > { %v4358_v24 = vsel %vm4340_vm2, 1.0, %v4152_v21  ;;  %vm4360_vm3 = vcmp.ge.s32.totalorder %v246_v18, 1  ;;  %vm4394_vm9 = vcmp.le.s32.totalorder %v246_v18, 14  ;;  %vm529_vm14 = vcmp.lt.s32.totalorder %v4324_v10, 1 }
  0x1b   : > { %vm4334_vm1 = vcmp.ge.s32.totalorder %v249_v12, 1  ;;  %vm4368_vm4 = vcmp.ge.s32.totalorder %v247_v19, 1  ;;  %vm258_vm5 = vmand %vm4340_vm2, %vm4360_vm3  ;;  %vm4398_vm10 = vcmp.le.s32.totalorder %v247_v19, 14  ;;  %vm666_vm15 = vcmp.lt.s32.totalorder %v4324_v10, 127 }
  0x1c   : > { %325 = vrot.lane.b32.xlu1 %v4246_v2, %s4143_s10  ;;  %321 = vrot.lane.b32.xlu0 %v4248_v3, %s4143_s10  ;;  %v4351_v22 = vsel %vm4334_vm1, 1.0, %v4152_v21  ;;  %vm259_vm6 = vmand %vm4334_vm1, %vm4368_vm4  ;;  %v4389_v40 = vsel %vm258_vm5, 1.0, %v4152_v21 }
  0x1d   : > { %v4392_v41 = vsel %vm259_vm6, 1.0, %v4152_v21  ;;  %vm268_vm11 = vmand %vm4340_vm2, %vm4394_vm9  ;;  %vm4507_vm2 = vcmp.le.s32.totalorder %v249_v12, 14 }
  0x1e   : > { %vm269_vm12 = vmand %vm4334_vm1, %vm4398_vm10  ;;  %v4429_v59 = vsel %vm268_vm11, 1.0, %v4152_v21  ;;  %vm4501_vm1 = vcmp.le.s32.totalorder %v248_v13, 14  ;;  %vm743_vm11 = vcmp.lt.s32.totalorder %v4324_v10, 113 }
  0x1f   : > { %v4432_v60 = vsel %vm269_vm12, 1.0, %v4152_v21  ;;  %vm282_vm5 = vmand %vm4501_vm1, %vm4360_vm3 }
  0x20   : > { %300 = vrot.lane.b32.xlu1 %v4248_v3, %s4144_s11  ;;  %298 = vrot.lane.b32.xlu0 %v4240_v1, %s4144_s11  ;;  %vm283_vm6 = vmand %vm4507_vm2, %vm4368_vm4 }
  0x21   : > { %vm293_vm12 = vmand %vm4507_vm2, %vm4398_vm10 }
  0x24   : > { %304 = vrot.lane.b32.xlu1 %v4246_v2, %s4144_s11  ;;  %302 = vrot.lane.b32.xlu0 %v4238_v0, %s4144_s11 }
  0x28   : > { %446 = vrot.lane.b32.xlu1 %v4248_v3, %s4146_s12  ;;  %444 = vrot.lane.b32.xlu0 %v4240_v1, %s4146_s12 }
  0x2c   : > { %450 = vrot.lane.b32.xlu1 %v4246_v2, %s4146_s12  ;;  %448 = vrot.lane.b32.xlu0 %v4238_v0, %s4146_s12 }
  0x30   : > { %523 = vrot.lane.b32.xlu1 %v4248_v3, %s4147_s13  ;;  %521 = vrot.lane.b32.xlu0 %v4240_v1, %s4147_s13 }
  0x34   : > { %527 = vrot.lane.b32.xlu1 %v4246_v2, %s4147_s13  ;;  %525 = vrot.lane.b32.xlu0 %v4238_v0, %s4147_s13 }
  0x38   : > { %660 = vrot.lane.b32.xlu1 %v4248_v3, %s4148_s14  ;;  %658 = vrot.lane.b32.xlu0 %v4240_v1, %s4148_s14 }
  0x3c   : > { %664 = vrot.lane.b32.xlu1 %v4246_v2, %s4148_s14  ;;  %662 = vrot.lane.b32.xlu0 %v4238_v0, %s4148_s14 }
  0x40   : > { %737 = vrot.lane.b32.xlu1 %v4248_v3, %s4149_s15  ;;  %735 = vrot.lane.b32.xlu0 %v4240_v1, %s4149_s15 }
  0x44   : > { %741 = vrot.lane.b32.xlu1 %v4246_v2, %s4149_s15  ;;  %739 = vrot.lane.b32.xlu0 %v4238_v0, %s4149_s15 }
  0x48   : > { %814 = vrot.lane.b32.xlu1 %v4248_v3, %s4150_s16  ;;  %812 = vrot.lane.b32.xlu0 %v4240_v1, %s4150_s16 }
  0x4c   : > { %818 = vrot.lane.b32.xlu1 %v4246_v2, %s4150_s16  ;;  %816 = vrot.lane.b32.xlu0 %v4238_v0, %s4150_s16 }
  0x50   : > { %891 = vrot.lane.b32.xlu1 %v4248_v3, %s4151_s17  ;;  %889 = vrot.lane.b32.xlu0 %v4240_v1, %s4151_s17  ;;  %v4494_v1 = vsel %vm4398_vm10, 1.0, %v4152_v21  ;;  %v3908_v3 = vld [vmem:[%s5529_s1 + $0x20] sm:$0xff]  }
  0x54   : > { %895 = vrot.lane.b32.xlu1 %v4246_v2, %s4151_s17  ;;  %893 = vrot.lane.b32.xlu0 %v4238_v0, %s4151_s17 }
  0x58   : > { %968 = vperm.xlu0 %3902, %v235_v7   ;;  %973 = vperm.xlu1 %3903, %v236_v8  }
  0x8a   : > { %v324_v14 = vpop.permute.xlu1 %323  ;;  %v320_v15 = vpop.permute.xlu0 %319 }
  0x8b   : > { %v330_v20 = vsel %vm327_vm0, %v324_v14, %v320_v15  ;;  %v328_v23 = vsel %vm327_vm0, %v320_v15, %v324_v14 }
  0x8c   : > { %v333_v31 = vmul.f32 %v4351_v22, %v328_v23  ;;  %v332_v33 = vmul.f32 %v4358_v24, %v330_v20 }
  0x8e   : > { %v326_v25 = vpop.permute.xlu1 %325  ;;  %v322_v26 = vpop.permute.xlu0 %321 }
  0x8f   : > { %v331_v28 = vsel %vm327_vm0, %v326_v25, %v322_v26  ;;  %v329_v29 = vsel %vm327_vm0, %v322_v26, %v326_v25  ;;  %v3906_v25 = vld [vmem:[%s5529_s1 + $0x10] sm:$0xff]   ;;  %v4455_v26 = vsel %vm4360_vm3, 1.0, %v4152_v21  ;;  %vm820_vm3 = vcmp.lt.s32.totalorder %v4324_v10, 112 }
  0x90   : > { %v335_v32 = vmul.f32 %v4351_v22, %v329_v29  ;;  %v334_v34 = vmul.f32 %v4358_v24, %v331_v28  ;;  %v4460_v28 = vsel %vm4368_vm4, 1.0, %v4152_v21  ;;  %vm292_vm4 = vmand %vm4501_vm1, %vm4394_vm9 }
  0x92   : > { %v301_v35 = vpop.permute.xlu1 %300  ;;  %v299_v36 = vpop.permute.xlu0 %298  ;;  %v340_v37 = vpack.c.bf16 %v335_v32, %v333_v31  ;;  %v339_v38 = vpack.c.bf16 %v334_v34, %v332_v33 }
  0x94   : > { %364 = vmatprep.subr.bf16.mxu0 %v340_v37 }
  0x95   : > { %365 = vmatpush1.bf16.msra.mxu0 %v339_v38 }
  0x96   : > { %v305_v42 = vpop.permute.xlu1 %304  ;;  %v303_v43 = vpop.permute.xlu0 %302 }
  0x97   : > { %v308_v46 = vsel %vm306_vm7, %v301_v35, %v305_v42  ;;  %v310_v47 = vsel %vm306_vm7, %v305_v42, %v301_v35  ;;  %v307_v48 = vsel %vm306_vm7, %v299_v36, %v303_v43  ;;  %v309_v49 = vsel %vm306_vm7, %v303_v43, %v299_v36  ;;  %v3907_v43 = vld [vmem:[%s5529_s1 + $0x18] sm:$0xff]  }
  0x98   : > { %v313_v50 = vmul.f32 %v4389_v40, %v310_v47  ;;  %v311_v51 = vmul.f32 %v4389_v40, %v309_v49  ;;  %v312_v52 = vmul.f32 %v4392_v41, %v307_v48  ;;  %v314_v53 = vmul.f32 %v4392_v41, %v308_v46  ;;  %3575 = vmatmul.mubr.msk.bf16.vlgmr.msra.gmra.mxu0 %vm346_vm8, %v3904_v39 }
  0x99   : > { %506 = vmatprep.mubr.bf16.mxu0 %v4145_v4  ;;  %v4489_v46 = vsel %vm4394_vm9, 1.0, %v4152_v21  ;;  %v4603_v48 = vsel %vm293_vm12, 1.0, %v4152_v21 }
  0x9a   : > { %v447_v54 = vpop.permute.xlu1 %446  ;;  %v445_v55 = vpop.permute.xlu0 %444  ;;  %v318_v56 = vpack.c.bf16 %v314_v53, %v312_v52  ;;  %v317_v57 = vpack.c.bf16 %v313_v50, %v311_v51 }
  0x9c   : > { %415 = vmatprep.subr.bf16.mxu1 %v318_v56 }
  0x9d   : > { %416 = vmatpush1.bf16.msra.mxu1 %v317_v57 }
  0x9e   : > { %v451_v61 = vpop.permute.xlu1 %450  ;;  %v449_v62 = vpop.permute.xlu0 %448 }
  0x9f   : > { %v454_v63 = vsel %vm452_vm13, %v447_v54, %v451_v61  ;;  %v456_v7 = vsel %vm452_vm13, %v451_v61, %v447_v54  ;;  %v453_v8 = vsel %vm452_vm13, %v445_v55, %v449_v62  ;;  %v455_v9 = vsel %vm452_vm13, %v449_v62, %v445_v55 }
  0xa0   : > { %v459_v14 = vmul.f32 %v4429_v59, %v456_v7  ;;  %v460_v15 = vmul.f32 %v4432_v60, %v454_v63  ;;  %v457_v16 = vmul.f32 %v4429_v59, %v455_v9  ;;  %v458_v17 = vmul.f32 %v4432_v60, %v453_v8  ;;  %3577 = vmatmul.mubr.msk.bf16.vlgmr.msra.gmra.mxu1 %vm346_vm8, %v3905_v58 }
  0xa1   : > { %583 = vmatprep.mubr.bf16.mxu1 %v4145_v4  ;;  %v4540_v61 = vsel %vm282_vm5, 1.0, %v4152_v21  ;;  %v4543_v62 = vsel %vm283_vm6, 1.0, %v4152_v21  ;;  %vm897_vm5 = vcmp.lt.s32.totalorder %v4324_v10, 111  ;;  %v3933_v10 = vld [vmem:[%s5531_s3 + $0x74] ss:$8 sps:$4 sm:$0xff]  }
  0xa2   : > { %v464_v18 = vpack.c.bf16 %v459_v14, %v457_v16  ;;  %v524_v19 = vpop.permute.xlu1 %523  ;;  %v522_v20 = vpop.permute.xlu0 %521  ;;  %v465_v23 = vpack.c.bf16 %v460_v15, %v458_v17 }
  0xa4   : > { %488 = vmatprep.subr.bf16.mxu0 %v465_v23 }
  0xa5   : > { %489 = vmatpush1.bf16.msra.mxu0 %v464_v18 }
  0xa6   : > { %v528_v29 = vpop.permute.xlu1 %527  ;;  %v526_v31 = vpop.permute.xlu0 %525  ;;  %625 = vmatprep.subr.bf16.mxu0 %v602_v5 }
  0xa7   : > { %v531_v32 = vsel %vm529_vm14, %v524_v19, %v528_v29  ;;  %v533_v33 = vsel %vm529_vm14, %v528_v29, %v524_v19  ;;  %v530_v34 = vsel %vm529_vm14, %v522_v20, %v526_v31  ;;  %v532_v35 = vsel %vm529_vm14, %v526_v31, %v522_v20  ;;  %v3910_v29 = vld [vmem:[%s5529_s1 + $0x30] sm:$0xff]  }
  0xa8   : > { %v536_v36 = vmul.f32 %v4455_v26, %v533_v33  ;;  %v537_v37 = vmul.f32 %v4460_v28, %v531_v32  ;;  %v534_v38 = vmul.f32 %v4455_v26, %v532_v35  ;;  %v535_v0 = vmul.f32 %v4460_v28, %v530_v34  ;;  %3581 = vmatmul.mubr.msk.bf16.vlgmr.msra.gmra.mxu0 %vm346_vm8, %v3906_v25 }
  0xa9   : > { %626 = vmatpush1.bf16.msra.mxu0 %v601_v6  ;;  %643 = vmatprep.mubr.bf16.mxu0 %v4145_v4  ;;  %v4566_v31 = vsel %vm4501_vm1, 1.0, %v4152_v21  ;;  %v4571_v32 = vsel %vm4507_vm2, 1.0, %v4152_v21 }
  0xaa   : > { %v541_v2 = vpack.c.bf16 %v536_v36, %v534_v38  ;;  %v661_v5 = vpop.permute.xlu1 %660  ;;  %v659_v39 = vpop.permute.xlu0 %658  ;;  %v542_v42 = vpack.c.bf16 %v537_v37, %v535_v0 }
  0xac   : > { %565 = vmatprep.subr.bf16.mxu1 %v542_v42 }
  0xad   : > { %566 = vmatpush1.bf16.msra.mxu1 %v541_v2 }
  0xae   : > { %v665_v6 = vpop.permute.xlu1 %664  ;;  %v663_v47 = vpop.permute.xlu0 %662 }
  0xaf   : > { %v668_v50 = vsel %vm666_vm15, %v661_v5, %v665_v6  ;;  %v670_v51 = vsel %vm666_vm15, %v665_v6, %v661_v5  ;;  %v667_v52 = vsel %vm666_vm15, %v659_v39, %v663_v47  ;;  %v669_v13 = vsel %vm666_vm15, %v663_v47, %v659_v39 }
  0xb0   : > { %v673_v53 = vmul.f32 %v4489_v46, %v668_v50  ;;  %v674_v11 = vmul.f32 %v4494_v1, %v670_v51  ;;  %v671_v12 = vmul.f32 %v4489_v46, %v667_v52  ;;  %v672_v54 = vmul.f32 %v4494_v1, %v669_v13  ;;  %3585 = vmatmul.mubr.msk.bf16.vlgmr.msra.gmra.mxu1 %vm346_vm8, %v3907_v43 }
  0xb1   : > { %3589 = vmatmul.mubr.msk.bf16.vlgmr.msra.gmra.mxu0 %vm346_vm8, %v3908_v3  ;;  %720 = vmatprep.mubr.bf16.mxu1 %v4145_v4  ;;  %v4600_v47 = vsel %vm292_vm4, 1.0, %v4152_v21 }
  0xb2   : > { %v678_v55 = vpack.c.bf16 %v673_v53, %v671_v12  ;;  %v738_v56 = vpop.permute.xlu1 %737  ;;  %v736_v57 = vpop.permute.xlu0 %735  ;;  %v679_v58 = vpack.c.bf16 %v674_v11, %v672_v54  ;;  %797 = vmatprep.mubr.bf16.mxu0 %v4145_v4 }
  0xb4   : > { %702 = vmatprep.subr.bf16.mxu1 %v679_v58 }
  0xb5   : > { %703 = vmatpush1.bf16.msra.mxu1 %v678_v55 }
  0xb6   : > { %v742_v30 = vpop.permute.xlu1 %741  ;;  %v740_v63 = vpop.permute.xlu0 %739 }
  0xb7   : > { %v745_v7 = vsel %vm743_vm11, %v738_v56, %v742_v30  ;;  %v747_v8 = vsel %vm743_vm11, %v742_v30, %v738_v56  ;;  %v744_v9 = vsel %vm743_vm11, %v736_v57, %v740_v63  ;;  %v746_v14 = vsel %vm743_vm11, %v740_v63, %v736_v57  ;;  %v3912_v57 = vld [vmem:[%s5529_s1 + $0x40] sm:$0xff]  }
  0xb8   : > { %v750_v15 = vmul.f32 %v4540_v61, %v745_v7  ;;  %v751_v16 = vmul.f32 %v4543_v62, %v747_v8  ;;  %v748_v17 = vmul.f32 %v4540_v61, %v744_v9  ;;  %v749_v18 = vmul.f32 %v4543_v62, %v746_v14  ;;  %3593 = vmatmul.mubr.msk.bf16.vlgmr.msra.gmra.mxu1 %vm346_vm8, %v3909_v27 }
  0xb9   : > { %874 = vmatprep.mubr.bf16.mxu1 %v4145_v4 }
  0xba   : > { %v755_v19 = vpack.c.bf16 %v750_v15, %v748_v17  ;;  %v815_v20 = vpop.permute.xlu1 %814  ;;  %v813_v23 = vpop.permute.xlu0 %812  ;;  %v756_v25 = vpack.c.bf16 %v751_v16, %v749_v18 }
  0xbc   : > { %779 = vmatprep.subr.bf16.mxu0 %v756_v25 }
  0xbd   : > { %780 = vmatpush1.bf16.msra.mxu0 %v755_v19 }
  0xbe   : > { %v819_v33 = vpop.permute.xlu1 %818  ;;  %v817_v34 = vpop.permute.xlu0 %816 }
  0xbf   : > { %v822_v35 = vsel %vm820_vm3, %v815_v20, %v819_v33  ;;  %v824_v36 = vsel %vm820_vm3, %v819_v33, %v815_v20  ;;  %v821_v37 = vsel %vm820_vm3, %v813_v23, %v817_v34  ;;  %v823_v38 = vsel %vm820_vm3, %v817_v34, %v813_v23 }
  0xc0   : > { %v827_v0 = vmul.f32 %v4566_v31, %v822_v35  ;;  %v828_v2 = vmul.f32 %v4571_v32, %v824_v36  ;;  %v825_v5 = vmul.f32 %v4566_v31, %v821_v37  ;;  %v826_v39 = vmul.f32 %v4571_v32, %v823_v38  ;;  %3597 = vmatmul.mubr.msk.bf16.vlgmr.msra.gmra.mxu0 %vm346_vm8, %v3910_v29 }
  0xc1   : > { %951 = vmatprep.mubr.bf16.mxu0 %v4145_v4 }
  0xc2   : > { %v832_v42 = vpack.c.bf16 %v827_v0, %v825_v5  ;;  %v892_v43 = vpop.permute.xlu1 %891  ;;  %v890_v3 = vpop.permute.xlu0 %889  ;;  %v833_v6 = vpack.c.bf16 %v828_v2, %v826_v39 }
  0xc4   : > { %856 = vmatprep.subr.bf16.mxu1 %v833_v6 }
  0xc5   : > { %857 = vmatpush1.bf16.msra.mxu1 %v832_v42 }
  0xc6   : > { %v896_v50 = vpop.permute.xlu1 %895  ;;  %v894_v51 = vpop.permute.xlu0 %893 }
  0xc7   : > { %v899_v45 = vsel %vm897_vm5, %v892_v43, %v896_v50  ;;  %v901_v49 = vsel %vm897_vm5, %v896_v50, %v892_v43  ;;  %v898_v52 = vsel %vm897_vm5, %v890_v3, %v894_v51  ;;  %v900_v13 = vsel %vm897_vm5, %v894_v51, %v890_v3 }
  0xc8   : > { %v904_v53 = vmul.f32 %v4600_v47, %v899_v45  ;;  %v905_v11 = vmul.f32 %v4603_v48, %v901_v49  ;;  %v902_v12 = vmul.f32 %v4600_v47, %v898_v52  ;;  %v903_v54 = vmul.f32 %v4603_v48, %v900_v13  ;;  %3601 = vmatmul.mubr.msk.bf16.vlgmr.msra.gmra.mxu1 %vm346_vm8, %v3911_v44 }
  0xc9   : > { %1066 = vmatprep.mubr.bf16.mxu1 %v4145_v4 }
  0xca   : > { %v909_v55 = vpack.c.bf16 %v904_v53, %v902_v12  ;;  %v910_v56 = vpack.c.bf16 %v905_v11, %v903_v54 }
  0xcc   : > { %933 = vmatprep.subr.bf16.mxu0 %v910_v56 }
  0xcd   : > { %934 = vmatpush1.bf16.msra.mxu0 %v909_v55 }
  0xd0   : > { %3605 = vmatmul.mubr.msk.bf16.vlgmr.msra.gmra.mxu0 %vm346_vm8, %v3912_v57 }
  0xd1   : > { %1117 = vmatprep.mubr.bf16.mxu0 %v4145_v4 }
  0xd3   : > { %v969_v55 = vpop.permute.xlu0 %968 }
 0x158   : > { %v384_v58 = vpop.f32.mrf.mxu0 }
 0x15a   : > { %v386_v27 = vpop.f32.mrf.mxu0 }
 0x15c   : > { %v388_v30 = vpop.f32.mrf.mxu0 }
 0x15e   : > { %v390_v7 = vpop.f32.mrf.mxu0 }
 0x160   : > { %v435_v63 = vpop.f32.mrf.mxu1 }
 0x161   : > { %v436_v35 = vadd.f32 %v435_v63, %v384_v58 }
 0x162   : > { %v437_v8 = vpop.f32.mrf.mxu1 }
 0x164   : > { %v439_v14 = vpop.f32.mrf.mxu1 }
 0x165   : > { %v440_v2 = vadd.f32 %v439_v14, %v388_v30 }
 0x166   : > { %v441_v16 = vpop.f32.mrf.mxu1 }
 0x168   : > { %v508_v9 = vpop.f32.mrf.mxu0 }
 0x169   : > { %v517_v38 = vadd.f32 %v508_v9, %v436_v35 }
 0x16a   : > { %v510_v15 = vpop.f32.mrf.mxu0 }
 0x16c   : > { %v512_v17 = vpop.f32.mrf.mxu0 }
 0x16d   : > { %v519_v43 = vadd.f32 %v512_v17, %v440_v2  ;;  %v442_v2 = vadd.f32 %v441_v16, %v390_v7 }
 0x16e   : > { %v514_v18 = vpop.f32.mrf.mxu0 }
 0x170   : > { %v585_v19 = vpop.f32.mrf.mxu1 }
 0x171   : > { %v645_v23 = vpop.f32.mrf.mxu0  ;;  %v594_v42 = vadd.f32 %v585_v19, %v517_v38  ;;  %v974_v19 = vpop.permute.xlu1 %973 }
 0x172   : > { %v587_v20 = vpop.f32.mrf.mxu1 }
 0x173   : > { %v647_v33 = vpop.f32.mrf.mxu0  ;;  %v654_v44 = vadd.f32 %v645_v23, %v594_v42  ;;  %v438_v23 = vadd.f32 %v437_v8, %v386_v27 }
 0x174   : > { %v589_v25 = vpop.f32.mrf.mxu1 }
 0x175   : > { %v649_v36 = vpop.f32.mrf.mxu0  ;;  %v596_v51 = vadd.f32 %v589_v25, %v519_v43 }
 0x176   : > { %v591_v29 = vpop.f32.mrf.mxu1 }
 0x177   : > { %v651_v0 = vpop.f32.mrf.mxu0  ;;  %v656_v13 = vadd.f32 %v649_v36, %v596_v51  ;;  %v518_v36 = vadd.f32 %v510_v15, %v438_v23  ;;  %v237_v51 = vld [vmem:[%s5530_s2 + $0x50] sm:$0xff] }
 0x178   : > { %v722_v34 = vpop.f32.mrf.mxu1 }
 0x179   : > { %v731_v49 = vadd.f32 %v722_v34, %v654_v44 }
 0x17a   : > { %v724_v37 = vpop.f32.mrf.mxu1 }
 0x17c   : > { %v726_v5 = vpop.f32.mrf.mxu1 }
 0x17d   : > { %v733_v12 = vadd.f32 %v726_v5, %v656_v13  ;;  %v595_v5 = vadd.f32 %v587_v20, %v518_v36 }
 0x17e   : > { %v728_v3 = vpop.f32.mrf.mxu1 }
 0x17f   : > { %v655_v27 = vadd.f32 %v647_v33, %v595_v5 }
 0x180   : > { %v799_v39 = vpop.f32.mrf.mxu0 }
 0x181   : > { %v808_v53 = vadd.f32 %v799_v39, %v731_v49  ;;  %v520_v39 = vadd.f32 %v514_v18, %v442_v2  ;;  %v732_v15 = vadd.f32 %v724_v37, %v655_v27 }
 0x182   : > { %v801_v6 = vpop.f32.mrf.mxu0 }
 0x183   : > { %v597_v8 = vadd.f32 %v591_v29, %v520_v39  ;;  %v809_v16 = vadd.f32 %v801_v6, %v732_v15 }
 0x184   : > { %v803_v45 = vpop.f32.mrf.mxu0 }
 0x185   : > { %v810_v58 = vadd.f32 %v803_v45, %v733_v12  ;;  %v657_v7 = vadd.f32 %v651_v0, %v597_v8  ;;  %v238_v45 = vld [vmem:[%s5530_s2 + $0x58] sm:$0xff] }
 0x186   : > { %v805_v11 = vpop.f32.mrf.mxu0 }
 0x187   : > { %v734_v42 = vadd.f32 %v728_v3, %v657_v7 }
 0x188   : > { %v876_v50 = vpop.f32.mrf.mxu1 }
 0x189   : > { %v885_v54 = vadd.f32 %v876_v50, %v808_v53  ;;  %v811_v33 = vadd.f32 %v805_v11, %v734_v42 }
 0x18a   : > { %v878_v52 = vpop.f32.mrf.mxu1 }
 0x18b   : > { %v886_v20 = vadd.f32 %v878_v52, %v809_v16 }
 0x18c   : > { %v880_v56 = vpop.f32.mrf.mxu1 }
 0x18d   : > { %v887_v9 = vadd.f32 %v880_v56, %v810_v58 }
 0x18e   : > { %v882_v18 = vpop.f32.mrf.mxu1 }
 0x18f   : > { %v888_v43 = vadd.f32 %v882_v18, %v811_v33 }
 0x190   : > { %v953_v57 = vpop.f32.mrf.mxu0 }
 0x191   : > { %v962_v30 = vadd.f32 %v953_v57, %v885_v54 }
 0x192   : > { %v955_v63 = vpop.f32.mrf.mxu0 }
 0x193   : > { %v976_v14 = vadd.f32 %v969_v55, %v962_v30  ;;  %v963_v29 = vadd.f32 %v955_v63, %v886_v20 }
 0x194   : > { %v957_v17 = vpop.f32.mrf.mxu0 }
 0x195   : > { %v4624_v25 = vmax.f32 %v976_v14, 0.0  ;;  %v964_v34 = vadd.f32 %v957_v17, %v887_v9  ;;  %v977_v0 = vadd.f32 %v969_v55, %v963_v29 }
 0x196   : > { %v959_v37 = vpop.f32.mrf.mxu0 }
 0x197   : > { %v978_v35 = vadd.f32 %v974_v19, %v964_v34  ;;  %1005 = vrot.lane.b32.xlu1 %v4624_v25, %s4143_s10  ;;  %v965_v3 = vadd.f32 %v959_v37, %v888_v43  ;;  %v4654_v6 = vmax.f32 %v977_v0, 0.0 }
 0x199   : > { %v4628_v38 = vmax.f32 %v978_v35, 0.0  ;;  %v979_v44 = vadd.f32 %v974_v19, %v965_v3  ;;  %v3913_v3 = vld [vmem:[%s5529_s1 + $0x50] sm:$0xff]  }
 0x19b   : > { %984 = vrot.lane.b32.xlu1 %v4624_v25, %s4144_s11  ;;  %1007 = vrot.lane.b32.xlu0 %v4628_v38, %s4143_s10  ;;  %v4660_v50 = vmax.f32 %v979_v44, 0.0 }
 0x19f   : > { %1128 = vrot.lane.b32.xlu1 %v4624_v25, %s4146_s12  ;;  %986 = vrot.lane.b32.xlu0 %v4628_v38, %s4144_s11 }
 0x1a3   : > { %1204 = vrot.lane.b32.xlu1 %v4624_v25, %s4147_s13  ;;  %1130 = vrot.lane.b32.xlu0 %v4628_v38, %s4146_s12 }
 0x1a7   : > { %1340 = vrot.lane.b32.xlu1 %v4624_v25, %s4148_s14  ;;  %1206 = vrot.lane.b32.xlu0 %v4628_v38, %s4147_s13 }
 0x1ab   : > { %1416 = vrot.lane.b32.xlu1 %v4624_v25, %s4149_s15  ;;  %1342 = vrot.lane.b32.xlu0 %v4628_v38, %s4148_s14 }
 0x1af   : > { %1492 = vrot.lane.b32.xlu1 %v4624_v25, %s4150_s16  ;;  %1418 = vrot.lane.b32.xlu0 %v4628_v38, %s4149_s15 }
 0x1b3   : > { %1009 = vrot.lane.b32.xlu1 %v4654_v6, %s4143_s10  ;;  %1494 = vrot.lane.b32.xlu0 %v4628_v38, %s4150_s16 }
 0x1b7   : > { %988 = vrot.lane.b32.xlu1 %v4654_v6, %s4144_s11  ;;  %1011 = vrot.lane.b32.xlu0 %v4660_v50, %s4143_s10 }
 0x1bb   : > { %1132 = vrot.lane.b32.xlu1 %v4654_v6, %s4146_s12  ;;  %990 = vrot.lane.b32.xlu0 %v4660_v50, %s4144_s11 }
 0x1bf   : > { %1208 = vrot.lane.b32.xlu1 %v4654_v6, %s4147_s13  ;;  %1134 = vrot.lane.b32.xlu0 %v4660_v50, %s4146_s12 }
 0x1c3   : > { %1568 = vrot.lane.b32.xlu1 %v4624_v25, %s4151_s17  ;;  %1210 = vrot.lane.b32.xlu0 %v4660_v50, %s4147_s13 }
 0x1c7   : > { %1344 = vrot.lane.b32.xlu1 %v4654_v6, %s4148_s14  ;;  %1570 = vrot.lane.b32.xlu0 %v4628_v38, %s4151_s17 }
 0x1cb   : > { %1420 = vrot.lane.b32.xlu1 %v4654_v6, %s4149_s15  ;;  %1346 = vrot.lane.b32.xlu0 %v4660_v50, %s4148_s14 }
 0x1cf   : > { %1496 = vrot.lane.b32.xlu1 %v4654_v6, %s4150_s16  ;;  %1422 = vrot.lane.b32.xlu0 %v4660_v50, %s4149_s15 }
 0x1d3   : > { %1572 = vrot.lane.b32.xlu1 %v4654_v6, %s4151_s17  ;;  %1498 = vrot.lane.b32.xlu0 %v4660_v50, %s4150_s16 }
 0x1d7   : > { %1646 = vperm.xlu1 %3903, %v237_v51   ;;  %1574 = vrot.lane.b32.xlu0 %v4660_v50, %s4151_s17 }
 0x1db   : > { %1651 = vperm.xlu0 %3902, %v238_v45  }
 0x209   : > { %v1006_v49 = vpop.permute.xlu1 %1005 }
 0x20d   : > { %v985_v52 = vpop.permute.xlu1 %984  ;;  %v1008_v13 = vpop.permute.xlu0 %1007 }
 0x211   : > { %v1129_v53 = vpop.permute.xlu1 %1128  ;;  %v987_v11 = vpop.permute.xlu0 %986 }
 0x215   : > { %v1205_v12 = vpop.permute.xlu1 %1204  ;;  %v1131_v54 = vpop.permute.xlu0 %1130 }
 0x219   : > { %v4702_v55 = vpop.permute.xlu1 %1340  ;;  %v1207_v56 = vpop.permute.xlu0 %1206 }
 0x21d   : > { %v4704_v57 = vpop.permute.xlu1 %1416  ;;  %v4706_v58 = vpop.permute.xlu0 %1342 }
 0x221   : > { %v4708_v30 = vpop.permute.xlu1 %1492  ;;  %v4710_v63 = vpop.permute.xlu0 %1418 }
 0x225   : > { %v1010_v9 = vpop.permute.xlu1 %1009  ;;  %v4712_v14 = vpop.permute.xlu0 %1494 }
 0x226   : > { %v1013_v17 = vsel %vm327_vm0, %v1006_v49, %v1010_v9  ;;  %v1015_v19 = vsel %vm327_vm0, %v1010_v9, %v1006_v49 }
 0x227   : > { %v1017_v2 = vmul.f32 %v4358_v24, %v1015_v19  ;;  %v1018_v5 = vmul.f32 %v4351_v22, %v1013_v17 }
 0x229   : > { %v989_v23 = vpop.permute.xlu1 %988  ;;  %v1012_v34 = vpop.permute.xlu0 %1011 }
 0x22a   : > { %v1014_v35 = vsel %vm327_vm0, %v1008_v13, %v1012_v34  ;;  %v1016_v36 = vsel %vm327_vm0, %v1012_v34, %v1008_v13  ;;  %v992_v8 = vsel %vm306_vm7, %v985_v52, %v989_v23  ;;  %v994_v15 = vsel %vm306_vm7, %v989_v23, %v985_v52 }
 0x22b   : > { %v1019_v39 = vmul.f32 %v4358_v24, %v1016_v36  ;;  %v1020_v27 = vmul.f32 %v4351_v22, %v1014_v35  ;;  %v996_v29 = vmul.f32 %v4389_v40, %v994_v15  ;;  %v997_v37 = vmul.f32 %v4392_v41, %v992_v8 }
 0x22d   : > { %v1024_v7 = vpack.c.bf16 %v1019_v39, %v1017_v2  ;;  %v1133_v16 = vpop.permute.xlu1 %1132  ;;  %v991_v42 = vpop.permute.xlu0 %990  ;;  %v1025_v20 = vpack.c.bf16 %v1020_v27, %v1018_v5 }
 0x22e   : > { %v993_v18 = vsel %vm306_vm7, %v987_v11, %v991_v42  ;;  %v995_v33 = vsel %vm306_vm7, %v991_v42, %v987_v11  ;;  %v1136_v44 = vsel %vm452_vm13, %v1129_v53, %v1133_v16  ;;  %v1138_v51 = vsel %vm452_vm13, %v1133_v16, %v1129_v53 }
 0x22f   : > { %v998_v43 = vmul.f32 %v4389_v40, %v995_v33  ;;  %v999_v0 = vmul.f32 %v4392_v41, %v993_v18  ;;  %1048 = vmatprep.subr.bf16.mxu1 %v1025_v20  ;;  %v1140_v17 = vmul.f32 %v4429_v59, %v1138_v51  ;;  %v1141_v19 = vmul.f32 %v4432_v60, %v1136_v44  ;;  %v3915_v20 = vld [vmem:[%s5529_s1 + $0x58] sm:$0xff]  }
 0x230   : > { %1049 = vmatpush1.bf16.msra.mxu1 %v1024_v7 }
 0x231   : > { %v1003_v45 = vpack.c.bf16 %v998_v43, %v996_v29  ;;  %v1209_v49 = vpop.permute.xlu1 %1208  ;;  %v1135_v52 = vpop.permute.xlu0 %1134  ;;  %v1004_v13 = vpack.c.bf16 %v999_v0, %v997_v37  ;;  %v1283_v37 = vpack.c.bf16 %v4628_v38, %v4624_v25 }
 0x232   : > { %v1137_v11 = vsel %vm452_vm13, %v1131_v54, %v1135_v52  ;;  %v1139_v9 = vsel %vm452_vm13, %v1135_v52, %v1131_v54  ;;  %v1212_v53 = vsel %vm529_vm14, %v1205_v12, %v1209_v49  ;;  %v1214_v35 = vsel %vm529_vm14, %v1209_v49, %v1205_v12  ;;  %v3914_v54 = vld [vmem:[%s5529_s1 + $0x48] sm:$0xff]  }
 0x233   : > { %v1142_v23 = vmul.f32 %v4429_v59, %v1139_v9  ;;  %v1143_v34 = vmul.f32 %v4432_v60, %v1137_v11  ;;  %3611 = vmatmul.mubr.msk.bf16.vlgmr.msra.gmra.mxu1 %vm346_vm8, %v3913_v3  ;;  %1099 = vmatprep.subr.bf16.mxu0 %v1004_v13  ;;  %v1284_v12 = vpack.c.bf16 %v4660_v50, %v4654_v6  ;;  %v3916_v3 = vld [vmem:[%s5529_s1 + $0x60] sm:$0xff]  }
 0x234   : > { %1189 = vmatprep.mubr.bf16.mxu1 %v4145_v4  ;;  %1100 = vmatpush1.bf16.msra.mxu0 %v1003_v45  ;;  %v1216_v15 = vmul.f32 %v4455_v26, %v1214_v35  ;;  %v1217_v7 = vmul.f32 %v4460_v28, %v1212_v53 }
 0x235   : > { %v1147_v36 = vpack.c.bf16 %v1142_v23, %v1140_v17  ;;  %v4762_v2 = vpop.permute.xlu1 %1568  ;;  %v1211_v5 = vpop.permute.xlu0 %1210  ;;  %v1148_v39 = vpack.c.bf16 %v1143_v34, %v1141_v19  ;;  %v3917_v17 = vld [vmem:[%s5529_s1 + $0x68] sm:$0xff]  }
 0x236   : > { %v1213_v27 = vsel %vm529_vm14, %v1207_v56, %v1211_v5  ;;  %v1215_v8 = vsel %vm529_vm14, %v1211_v5, %v1207_v56 }
 0x237   : > { %v1218_v16 = vmul.f32 %v4455_v26, %v1215_v8  ;;  %v1219_v42 = vmul.f32 %v4460_v28, %v1213_v27  ;;  %1171 = vmatprep.subr.bf16.mxu1 %v1148_v39  ;;  %3613 = vmatmul.mubr.msk.bf16.vlgmr.msra.gmra.mxu0 %vm346_vm8, %v3914_v54 }
 0x238   : > { %1172 = vmatpush1.bf16.msra.mxu1 %v1147_v36  ;;  %1265 = vmatprep.mubr.bf16.mxu0 %v4145_v4 }
 0x239   : > { %v1223_v56 = vpack.c.bf16 %v1218_v16, %v1216_v15  ;;  %v1345_v18 = vpop.permute.xlu1 %1344  ;;  %v4778_v33 = vpop.permute.xlu0 %1570  ;;  %1307 = vmatprep.subr.bf16.mxu1 %v1284_v12  ;;  %v1224_v29 = vpack.c.bf16 %v1219_v42, %v1217_v7 }
 0x23a   : > { %v1348_v43 = vsel %vm666_vm15, %v4702_v55, %v1345_v18  ;;  %v1350_v0 = vsel %vm666_vm15, %v1345_v18, %v4702_v55 }
 0x23b   : > { %3617 = vmatmul.mubr.msk.bf16.vlgmr.msra.gmra.mxu1 %vm346_vm8, %v3915_v20  ;;  %1247 = vmatprep.subr.bf16.mxu0 %v1224_v29  ;;  %v1352_v45 = vmul.f32 %v4489_v46, %v1348_v43  ;;  %v1353_v52 = vmul.f32 %v4494_v1, %v1350_v0  ;;  %v3919_v43 = vld [vmem:[%s5529_s1 + $0x78] sm:$0xff]  }
 0x23c   : > { %1248 = vmatpush1.bf16.msra.mxu0 %v1223_v56  ;;  %1308 = vmatpush1.bf16.msra.mxu1 %v1283_v37 }
 0x23d   : > { %v1421_v44 = vpop.permute.xlu1 %1420  ;;  %v1347_v51 = vpop.permute.xlu0 %1346  ;;  %1325 = vmatprep.mubr.bf16.mxu1 %v4145_v4 }
 0x23e   : > { %v1349_v49 = vsel %vm666_vm15, %v4706_v58, %v1347_v51  ;;  %v1351_v55 = vsel %vm666_vm15, %v1347_v51, %v4706_v58  ;;  %v1424_v13 = vsel %vm743_vm11, %v4704_v57, %v1421_v44  ;;  %v1426_v19 = vsel %vm743_vm11, %v1421_v44, %v4704_v57 }
 0x23f   : > { %v1354_v11 = vmul.f32 %v4489_v46, %v1349_v49  ;;  %v1355_v9 = vmul.f32 %v4494_v1, %v1351_v55  ;;  %3621 = vmatmul.mubr.msk.bf16.vlgmr.msra.gmra.mxu0 %vm346_vm8, %v3916_v3  ;;  %v1428_v35 = vmul.f32 %v4540_v61, %v1424_v13  ;;  %v1429_v57 = vmul.f32 %v4543_v62, %v1426_v19  ;;  %v3920_v13 = vld [vmem:[%s5529_s1 + $0x80] sm:$0xff]  }
 0x240   : > { %1401 = vmatprep.mubr.bf16.mxu0 %v4145_v4 }
 0x241   : > { %v1359_v58 = vpack.c.bf16 %v1354_v11, %v1352_v45  ;;  %v1497_v23 = vpop.permute.xlu1 %1496  ;;  %v1423_v34 = vpop.permute.xlu0 %1422  ;;  %v1360_v53 = vpack.c.bf16 %v1355_v9, %v1353_v52 }
 0x242   : > { %v1425_v54 = vsel %vm743_vm11, %v4710_v63, %v1423_v34  ;;  %v1427_v36 = vsel %vm743_vm11, %v1423_v34, %v4710_v63  ;;  %v1500_v5 = vsel %vm820_vm3, %v4708_v30, %v1497_v23  ;;  %v1502_v8 = vsel %vm820_vm3, %v1497_v23, %v4708_v30  ;;  %v3918_v63 = vld [vmem:[%s5529_s1 + $0x70] sm:$0xff]  }
 0x243   : > { %v1430_v39 = vmul.f32 %v4540_v61, %v1425_v54  ;;  %v1431_v27 = vmul.f32 %v4543_v62, %v1427_v36  ;;  %3625 = vmatmul.mubr.msk.bf16.vlgmr.msra.gmra.mxu1 %vm346_vm8, %v3917_v17  ;;  %1383 = vmatprep.subr.bf16.mxu0 %v1360_v53  ;;  %v1504_v42 = vmul.f32 %v4566_v31, %v1500_v5 }
 0x244   : > { %1477 = vmatprep.mubr.bf16.mxu1 %v4145_v4  ;;  %1384 = vmatpush1.bf16.msra.mxu0 %v1359_v58  ;;  %v1505_v56 = vmul.f32 %v4571_v32, %v1502_v8 }
 0x245   : > { %v1435_v12 = vpack.c.bf16 %v1430_v39, %v1428_v35  ;;  %v1573_v15 = vpop.permute.xlu1 %1572  ;;  %v1499_v7 = vpop.permute.xlu0 %1498  ;;  %v1436_v16 = vpack.c.bf16 %v1431_v27, %v1429_v57 }
 0x246   : > { %v1501_v20 = vsel %vm820_vm3, %v4712_v14, %v1499_v7  ;;  %v1503_v30 = vsel %vm820_vm3, %v1499_v7, %v4712_v14  ;;  %v1576_v18 = vsel %vm897_vm5, %v4762_v2, %v1573_v15  ;;  %v1578_v0 = vsel %vm897_vm5, %v1573_v15, %v4762_v2 }
 0x247   : > { %v1506_v29 = vmul.f32 %v4566_v31, %v1501_v20  ;;  %v1507_v37 = vmul.f32 %v4571_v32, %v1503_v30  ;;  %1459 = vmatprep.subr.bf16.mxu1 %v1436_v16  ;;  %3629 = vmatmul.mubr.msk.bf16.vlgmr.msra.gmra.mxu0 %vm346_vm8, %v3918_v63  ;;  %v1580_v51 = vmul.f32 %v4600_v47, %v1576_v18 }
 0x248   : > { %1460 = vmatpush1.bf16.msra.mxu1 %v1435_v12  ;;  %1553 = vmatprep.mubr.bf16.mxu0 %v4145_v4  ;;  %v1581_v2 = vmul.f32 %v4603_v48, %v1578_v0 }
 0x249   : > { %v1511_v14 = vpack.c.bf16 %v1506_v29, %v1504_v42  ;;  %v1575_v3 = vpop.permute.xlu0 %1574  ;;  %v1512_v44 = vpack.c.bf16 %v1507_v37, %v1505_v56 }
 0x24a   : > { %v1577_v45 = vsel %vm897_vm5, %v4778_v33, %v1575_v3  ;;  %v1579_v49 = vsel %vm897_vm5, %v1575_v3, %v4778_v33  ;;  %v3921_v33 = vld [vmem:[%s5529_s1 + $0x88] sm:$0xff]  }
 0x24b   : > { %v1582_v55 = vmul.f32 %v4600_v47, %v1577_v45  ;;  %v1583_v52 = vmul.f32 %v4603_v48, %v1579_v49  ;;  %3633 = vmatmul.mubr.msk.bf16.vlgmr.msra.gmra.mxu1 %vm346_vm8, %v3919_v43  ;;  %1535 = vmatprep.subr.bf16.mxu0 %v1512_v44 }
 0x24c   : > { %1536 = vmatpush1.bf16.msra.mxu0 %v1511_v14  ;;  %1629 = vmatprep.mubr.bf16.mxu1 %v4145_v4 }
 0x24d   : > { %v1587_v11 = vpack.c.bf16 %v1582_v55, %v1580_v51  ;;  %v1588_v9 = vpack.c.bf16 %v1583_v52, %v1581_v2 }
 0x24f   : > { %1611 = vmatprep.subr.bf16.mxu1 %v1588_v9  ;;  %3637 = vmatmul.mubr.msk.bf16.vlgmr.msra.gmra.mxu0 %vm346_vm8, %v3920_v13 }
 0x250   : > { %1612 = vmatpush1.bf16.msra.mxu1 %v1587_v11  ;;  %1752 = vmatprep.mubr.bf16.mxu0 %v4145_v4 }
 0x253   : > { %3641 = vmatmul.mubr.msk.bf16.vlgmr.msra.gmra.mxu1 %vm346_vm8, %v3921_v33 }
 0x254   : > { %1803 = vmatprep.mubr.bf16.mxu1 %v4145_v4 }
 0x2f3   : > { %v1068_v17 = vpop.f32.mrf.mxu1 }
 0x2f5   : > { %v1070_v19 = vpop.f32.mrf.mxu1 }
 0x2f7   : > { %v1072_v58 = vpop.f32.mrf.mxu1  ;;  %v1119_v23 = vpop.f32.mrf.mxu0 }
 0x2f8   : > { %v1120_v7 = vadd.f32 %v1119_v23, %v1068_v17 }
 0x2f9   : > { %v1074_v34 = vpop.f32.mrf.mxu1  ;;  %v1121_v53 = vpop.f32.mrf.mxu0 }
 0x2fa   : > { %v1122_v20 = vadd.f32 %v1121_v53, %v1070_v19 }
 0x2fb   : > { %v1191_v35 = vpop.f32.mrf.mxu1  ;;  %v1123_v54 = vpop.f32.mrf.mxu0 }
 0x2fc   : > { %v1200_v30 = vadd.f32 %v1191_v35, %v1120_v7  ;;  %v1124_v29 = vadd.f32 %v1123_v54, %v1072_v58  ;;  %v1647_v7 = vpop.permute.xlu1 %1646 }
 0x2fd   : > { %v1193_v36 = vpop.f32.mrf.mxu1  ;;  %v1125_v57 = vpop.f32.mrf.mxu0 }
 0x2fe   : > { %v1201_v37 = vadd.f32 %v1193_v36, %v1122_v20  ;;  %v1126_v49 = vadd.f32 %v1125_v57, %v1074_v34 }
 0x2ff   : > { %v1195_v5 = vpop.f32.mrf.mxu1  ;;  %v1267_v39 = vpop.f32.mrf.mxu0 }
 0x300   : > { %v1276_v43 = vadd.f32 %v1267_v39, %v1200_v30  ;;  %v1202_v3 = vadd.f32 %v1195_v5, %v1124_v29 }
 0x301   : > { %v1197_v27 = vpop.f32.mrf.mxu1  ;;  %v1269_v8 = vpop.f32.mrf.mxu0 }
 0x302   : > { %v1277_v44 = vadd.f32 %v1269_v8, %v1201_v37  ;;  %v1203_v9 = vadd.f32 %v1197_v27, %v1126_v49 }
 0x303   : > { %v1327_v63 = vpop.f32.mrf.mxu1  ;;  %v1271_v12 = vpop.f32.mrf.mxu0 }
 0x304   : > { %v1336_v51 = vadd.f32 %v1327_v63, %v1276_v43  ;;  %v1278_v55 = vadd.f32 %v1271_v12, %v1202_v3  ;;  %v1652_v3 = vpop.permute.xlu0 %1651 }
 0x305   : > { %v1329_v15 = vpop.f32.mrf.mxu1  ;;  %v1273_v16 = vpop.f32.mrf.mxu0 }
 0x306   : > { %v1337_v52 = vadd.f32 %v1329_v15, %v1277_v44  ;;  %v1279_v53 = vadd.f32 %v1273_v16, %v1203_v9 }
 0x307   : > { %v1331_v42 = vpop.f32.mrf.mxu1  ;;  %v1403_v56 = vpop.f32.mrf.mxu0 }
 0x308   : > { %v1412_v13 = vadd.f32 %v1403_v56, %v1336_v51  ;;  %v1338_v17 = vadd.f32 %v1331_v42, %v1278_v55 }
 0x309   : > { %v1333_v18 = vpop.f32.mrf.mxu1  ;;  %v1405_v0 = vpop.f32.mrf.mxu0 }
 0x30a   : > { %v1413_v19 = vadd.f32 %v1405_v0, %v1337_v52  ;;  %v1339_v8 = vadd.f32 %v1333_v18, %v1279_v53  ;;  %v239_v53 = vld [vmem:[%s5530_s2 + $0x60] sm:$0xff] }
 0x30b   : > { %v1479_v14 = vpop.f32.mrf.mxu1  ;;  %v1407_v45 = vpop.f32.mrf.mxu0 }
 0x30c   : > { %v1488_v23 = vadd.f32 %v1479_v14, %v1412_v13  ;;  %v1414_v54 = vadd.f32 %v1407_v45, %v1338_v17 }
 0x30d   : > { %v1481_v2 = vpop.f32.mrf.mxu1  ;;  %v1409_v11 = vpop.f32.mrf.mxu0 }
 0x30e   : > { %v1489_v36 = vadd.f32 %v1481_v2, %v1413_v19  ;;  %v1415_v20 = vadd.f32 %v1409_v11, %v1339_v8 }
 0x30f   : > { %v1483_v33 = vpop.f32.mrf.mxu1  ;;  %v1555_v58 = vpop.f32.mrf.mxu0 }
 0x310   : > { %v1564_v5 = vadd.f32 %v1555_v58, %v1488_v23  ;;  %v1490_v34 = vadd.f32 %v1483_v33, %v1414_v54  ;;  %v240_v23 = vld [vmem:[%s5530_s2 + $0x68] sm:$0xff]  ;;  %v241_v58 = vld [vmem:[%s5530_s2 + $0x70] sm:$0xff] }
 0x311   : > { %v1485_v35 = vpop.f32.mrf.mxu1  ;;  %v1557_v39 = vpop.f32.mrf.mxu0 }
 0x312   : > { %v1565_v57 = vadd.f32 %v1557_v39, %v1489_v36  ;;  %v1491_v37 = vadd.f32 %v1485_v35, %v1415_v20  ;;  %v242_v35 = vld [vmem:[%s5530_s2 + $0x78] sm:$0xff] }
 0x313   : > { %v1631_v63 = vpop.f32.mrf.mxu1  ;;  %v1559_v12 = vpop.f32.mrf.mxu0 }
 0x314   : > { %v1640_v15 = vadd.f32 %v1631_v63, %v1564_v5  ;;  %v1566_v30 = vadd.f32 %v1559_v12, %v1490_v34 }
 0x315   : > { %v1633_v27 = vpop.f32.mrf.mxu1  ;;  %v1561_v56 = vpop.f32.mrf.mxu0 }
 0x316   : > { %v1654_v42 = vadd.f32 %v1647_v7, %v1640_v15  ;;  %v1641_v29 = vadd.f32 %v1633_v27, %v1565_v57  ;;  %v1567_v18 = vadd.f32 %v1561_v56, %v1491_v37  ;;  %v3922_v37 = vld [vmem:[%s5529_s1 + $0x90] sm:$0xff]  }
 0x317   : > { %v1635_v16 = vpop.f32.mrf.mxu1 }
 0x318   : > { %vm1658_vm9 = vcmp.gt.f32.partialorder %v1654_v42, 0.0  ;;  %v1662_v43 = vmul.f32 0.1, %v1654_v42  ;;  %v1655_v0 = vadd.f32 %v1647_v7, %v1641_v29  ;;  %v1642_v14 = vadd.f32 %v1635_v16, %v1566_v30 }
 0x319   : > { %v1637_v44 = vpop.f32.mrf.mxu1 }
 0x31a   : > { %v4879_v51 = vsel %vm1658_vm9, %v1654_v42, %v1662_v43  ;;  %v1663_v45 = vmul.f32 0.1, %v1655_v0  ;;  %v1656_v49 = vadd.f32 %v1652_v3, %v1642_v14  ;;  %vm1659_vm10 = vcmp.gt.f32.partialorder %v1655_v0, 0.0 }
 0x31b   : > { %v1643_v2 = vadd.f32 %v1637_v44, %v1567_v18  ;;  %1670 = vrot.lane.b32.xlu1 %v4879_v51, %s4144_s11 }
 0x31c   : > { %vm1660_vm1 = vcmp.gt.f32.partialorder %v1656_v49, 0.0  ;;  %v1664_v55 = vmul.f32 0.1, %v1656_v49  ;;  %v4883_v13 = vsel %vm1659_vm10, %v1655_v0, %v1663_v45 }
 0x31d   : > { %v1657_v52 = vadd.f32 %v1652_v3, %v1643_v2 }
 0x31e   : > { %v4885_v11 = vsel %vm1660_vm1, %v1656_v49, %v1664_v55 }
 0x31f   : > { %vm1661_vm2 = vcmp.gt.f32.partialorder %v1657_v52, 0.0  ;;  %v1665_v9 = vmul.f32 0.1, %v1657_v52  ;;  %1674 = vrot.lane.b32.xlu1 %v4883_v13, %s4144_s11  ;;  %1672 = vrot.lane.b32.xlu0 %v4885_v11, %s4144_s11  ;;  %v1969_v33 = vpack.c.bf16 %v4885_v11, %v4879_v51 }
 0x321   : > { %v4893_v17 = vsel %vm1661_vm2, %v1657_v52, %v1665_v9  ;;  %v3923_v9 = vld [vmem:[%s5529_s1 + $0xa8] sm:$0xff]  }
 0x322   : > { %v1970_v19 = vpack.c.bf16 %v4893_v17, %v4883_v13 }
 0x323   : > { %1890 = vrot.lane.b32.xlu1 %v4879_v51, %s4147_s13  ;;  %1676 = vrot.lane.b32.xlu0 %v4893_v17, %s4144_s11  ;;  %s215_s11 = sand.u32 1, %s4133_s19  }
 0x327   : > { %1894 = vrot.lane.b32.xlu1 %v4883_v13, %s4147_s13  ;;  %1892 = vrot.lane.b32.xlu0 %v4885_v11, %s4147_s13 }
 0x32b   : > { %2026 = vrot.lane.b32.xlu1 %v4879_v51, %s4148_s14  ;;  %1896 = vrot.lane.b32.xlu0 %v4893_v17, %s4147_s13 }
 0x32f   : > { %2030 = vrot.lane.b32.xlu1 %v4883_v13, %s4148_s14  ;;  %2028 = vrot.lane.b32.xlu0 %v4885_v11, %s4148_s14 }
 0x333   : > { %2178 = vrot.lane.b32.xlu1 %v4879_v51, %s4150_s16  ;;  %2032 = vrot.lane.b32.xlu0 %v4893_v17, %s4148_s14 }
 0x337   : > { %2182 = vrot.lane.b32.xlu1 %v4883_v13, %s4150_s16  ;;  %2180 = vrot.lane.b32.xlu0 %v4885_v11, %s4150_s16 }
 0x33b   : > { %1691 = vrot.lane.b32.xlu1 %v4879_v51, %s4143_s10  ;;  %2184 = vrot.lane.b32.xlu0 %v4893_v17, %s4150_s16  ;;  %s3843_s16 = sshll.u32 %s4206_s22, 9  ;;  %s5487_s22 = scalar_lea.sflag [#allocation3], %s215_s11 }
 0x33c   : > { %s5485_s7 = scalar_lea.hbm %s5533_s5, %s3843_s16 }
 0x33f   : > { %1695 = vrot.lane.b32.xlu1 %v4883_v13, %s4143_s10  ;;  %1693 = vrot.lane.b32.xlu0 %v4885_v11, %s4143_s10 }
 0x343   : > { %1814 = vrot.lane.b32.xlu1 %v4879_v51, %s4146_s12  ;;  %1697 = vrot.lane.b32.xlu0 %v4893_v17, %s4143_s10 }
 0x347   : > { %1818 = vrot.lane.b32.xlu1 %v4883_v13, %s4146_s12  ;;  %1816 = vrot.lane.b32.xlu0 %v4885_v11, %s4146_s12 }
 0x34b   : > { %2102 = vrot.lane.b32.xlu1 %v4879_v51, %s4149_s15  ;;  %1820 = vrot.lane.b32.xlu0 %v4893_v17, %s4146_s12  ;;  %s3553_s12 = sshll.u32 %s215_s11, 5 }
 0x34c   : > { %s217_s13 = scalar_lea.vmem [#allocation2], %s3553_s12 }
 0x34d   : > { %s3487_s14 = sshll.u32 %s217_s13, 4  ;;  %s5480_s14 = int_to_ptr.vmem [resolvable:$true] %s3487_s14 }
 0x34e   : > { %p4088_p0 = scmp.lt.s32.totalorder %s5480_s14, %s4086_s9 }
 0x34f   : > { %2106 = vrot.lane.b32.xlu1 %v4883_v13, %s4149_s15  ;;  %2104 = vrot.lane.b32.xlu0 %v4885_v11, %s4149_s15 }
 0x353   : > { %2254 = vrot.lane.b32.xlu1 %v4879_v51, %s4151_s17  ;;  %2108 = vrot.lane.b32.xlu0 %v4893_v17, %s4149_s15  ;;  %v3960_v51 = vld [vmem:[%s5531_s3 + $0x134] ss:$8 sps:$4 sm:$0xff]  }
 0x357   : > { %2258 = vrot.lane.b32.xlu1 %v4883_v13, %s4151_s17  ;;  %2256 = vrot.lane.b32.xlu0 %v4885_v11, %s4151_s17  ;;  %v3928_v11 = vld [vmem:[%s5529_s1 + $0xb0] sm:$0xff]  }
 0x35b   : > { %2337 = vperm.xlu1 %3903, %v240_v23   ;;  %2260 = vrot.lane.b32.xlu0 %v4893_v17, %s4151_s17  ;;  %s4081_s17 = scalar_lea.vmem %s5480_s14, 512 }
 0x35c   : > { %p4082_p11 = scmp.ne.s32.totalorder %s5480_s14, %s4081_s17  ;;  %p4089_p1 = scmp.lt.s32.totalorder %s4087_s23, %s4081_s17 }
 0x35e   : > { %p4083_p12 = pnand %p4082_p11, %p4223_p5  ;;  %p4090_p2 = por %p4089_p1, %p4088_p0 }
 0x35f   : > { %3377 = vperm.xlu1 %3903, %v241_v58   ;;  %2332 = vperm.xlu0 %3902, %v239_v53  }
 0x360   : > { %p4084_p13 = pneg %p4083_p12 }
 0x362   : > { %p4091_p3 = pnand %p4090_p2, %p4084_p13 }
 0x363   : > { %3382 = vperm.xlu0 %3902, %v242_v35  }
 0x38d   : > { %v1671_v54 = vpop.permute.xlu1 %1670 }
 0x391   : > { %v1675_v36 = vpop.permute.xlu1 %1674  ;;  %v1673_v5 = vpop.permute.xlu0 %1672 }
 0x392   : > { %v1678_v39 = vsel %vm306_vm7, %v1671_v54, %v1675_v36  ;;  %v1680_v8 = vsel %vm306_vm7, %v1675_v36, %v1671_v54 }
 0x393   : > { %v1682_v15 = vmul.f32 %v4389_v40, %v1680_v8  ;;  %v1683_v7 = vmul.f32 %v4392_v41, %v1678_v39 }
 0x395   : > { %v1891_v63 = vpop.permute.xlu1 %1890  ;;  %v1677_v34 = vpop.permute.xlu0 %1676 }
 0x396   : > { %v1679_v57 = vsel %vm306_vm7, %v1673_v5, %v1677_v34  ;;  %v1681_v12 = vsel %vm306_vm7, %v1677_v34, %v1673_v5  ;;  %vm3385_vm7 = vcmask 261120  }
 0x397   : > { %v1684_v20 = vmul.f32 %v4389_v40, %v1681_v12  ;;  %v1685_v27 = vmul.f32 %v4392_v41, %v1679_v57  ;;  %v3924_v12 = vld [vmem:[%s5529_s1 + $0xb8] sm:$0xff]  }
 0x399   : > { %v1689_v30 = vpack.c.bf16 %v1684_v20, %v1682_v15  ;;  %v1895_v42 = vpop.permute.xlu1 %1894  ;;  %v1893_v56 = vpop.permute.xlu0 %1892  ;;  %v1690_v29 = vpack.c.bf16 %v1685_v27, %v1683_v7 }
 0x39a   : > { %v1898_v16 = vsel %vm529_vm14, %v1891_v63, %v1895_v42  ;;  %v1900_v43 = vsel %vm529_vm14, %v1895_v42, %v1891_v63 }
 0x39b   : > { %1785 = vmatprep.subr.bf16.mxu1 %v1690_v29  ;;  %v1902_v3 = vmul.f32 %v4455_v26, %v1900_v43  ;;  %v1903_v18 = vmul.f32 %v4460_v28, %v1898_v16 }
 0x39c   : > { %1786 = vmatpush1.bf16.msra.mxu1 %v1689_v30 }
 0x39d   : > { %v2027_v0 = vpop.permute.xlu1 %2026  ;;  %v1897_v40 = vpop.permute.xlu0 %1896 }
 0x39e   : > { %v1899_v41 = vsel %vm529_vm14, %v1893_v56, %v1897_v40  ;;  %v1901_v14 = vsel %vm529_vm14, %v1897_v40, %v1893_v56  ;;  %v3925_v40 = vld [vmem:[%s5529_s1 + $0xc8] sm:$0xff]  }
 0x39f   : > { %v1904_v44 = vmul.f32 %v4455_v26, %v1901_v14  ;;  %v1905_v45 = vmul.f32 %v4460_v28, %v1899_v41  ;;  %3649 = vmatmul.mubr.msk.bf16.vlgmr.msra.gmra.mxu1 %vm346_vm8, %v3922_v37 }
 0x3a0   : > { %1951 = vmatprep.mubr.bf16.mxu1 %v4145_v4 }
 0x3a1   : > { %v1909_v49 = vpack.c.bf16 %v1904_v44, %v1902_v3  ;;  %v2031_v2 = vpop.permute.xlu1 %2030  ;;  %v2029_v55 = vpop.permute.xlu0 %2028  ;;  %v1910_v52 = vpack.c.bf16 %v1905_v45, %v1903_v18 }
 0x3a2   : > { %v2034_v23 = vsel %vm666_vm15, %v2027_v0, %v2031_v2  ;;  %v2036_v26 = vsel %vm666_vm15, %v2031_v2, %v2027_v0 }
 0x3a3   : > { %1933 = vmatprep.subr.bf16.mxu1 %v1910_v52  ;;  %v2038_v54 = vmul.f32 %v4489_v46, %v2034_v23  ;;  %v2039_v36 = vmul.f32 %v4494_v1, %v2036_v26 }
 0x3a4   : > { %1934 = vmatpush1.bf16.msra.mxu1 %v1909_v49 }
 0x3a5   : > { %v2179_v28 = vpop.permute.xlu1 %2178  ;;  %v2033_v58 = vpop.permute.xlu0 %2032 }
 0x3a6   : > { %v2035_v53 = vsel %vm666_vm15, %v2029_v55, %v2033_v58  ;;  %v2037_v35 = vsel %vm666_vm15, %v2033_v58, %v2029_v55  ;;  %v3936_v55 = vld [vmem:[%s5531_s3 + $0x174] ss:$8 sps:$4 sm:$0xff]   ;;  %v228_v58 = vld [vmem:[%s5530_s2] sm:$0xff] }
 0x3a7   : > { %v2040_v5 = vmul.f32 %v4489_v46, %v2035_v53  ;;  %v2041_v39 = vmul.f32 %v4494_v1, %v2037_v35  ;;  %3657 = vmatmul.mubr.msk.bf16.vlgmr.msra.gmra.mxu1 %vm346_vm8, %v3923_v9  ;;  %v3934_v53 = vld [vmem:[%s5531_s3 + $0x170] ss:$8 sps:$4 sm:$0xff]  }
 0x3a8   : > { %2087 = vmatprep.mubr.bf16.mxu1 %v4145_v4 }
 0x3a9   : > { %v2045_v8 = vpack.c.bf16 %v2040_v5, %v2038_v54  ;;  %v2183_v63 = vpop.permute.xlu1 %2182  ;;  %v2181_v34 = vpop.permute.xlu0 %2180  ;;  %v2046_v57 = vpack.c.bf16 %v2041_v39, %v2039_v36  ;;  %v3942_v36 = vld [vmem:[%s5531_s3 + $0x164] ss:$8 sps:$4 sm:$0xff]  }
 0x3aa   : > { %v2186_v15 = vsel %vm820_vm3, %v2179_v28, %v2183_v63  ;;  %v2188_v46 = vsel %vm820_vm3, %v2183_v63, %v2179_v28 }
 0x3ab   : > { %2069 = vmatprep.subr.bf16.mxu1 %v2046_v57  ;;  %v2190_v30 = vmul.f32 %v4566_v31, %v2186_v15  ;;  %v2191_v42 = vmul.f32 %v4571_v32, %v2188_v46 }
 0x3ac   : > { %2070 = vmatpush1.bf16.msra.mxu1 %v2045_v8 }
 0x3ad   : > { %v1692_v1 = vpop.permute.xlu1 %1691  ;;  %v2185_v7 = vpop.permute.xlu0 %2184 }
 0x3ae   : > { %v2187_v20 = vsel %vm820_vm3, %v2181_v34, %v2185_v7  ;;  %v2189_v27 = vsel %vm820_vm3, %v2185_v7, %v2181_v34 }
 0x3af   : > { %v2192_v56 = vmul.f32 %v4566_v31, %v2187_v20  ;;  %v2193_v29 = vmul.f32 %v4571_v32, %v2189_v27  ;;  %3665 = vmatmul.mubr.msk.bf16.vlgmr.msra.gmra.mxu1 %vm346_vm8, %v3924_v12  ;;  %v3940_v12 = vld [vmem:[%s5531_s3 + $0x160] ss:$8 sps:$4 sm:$0xff]  }
 0x3b0   : > { %2239 = vmatprep.mubr.bf16.mxu1 %v4145_v4 }
 0x3b1   : > { %v2197_v37 = vpack.c.bf16 %v2192_v56, %v2190_v30  ;;  %v1696_v16 = vpop.permute.xlu1 %1695  ;;  %v1694_v43 = vpop.permute.xlu0 %1693  ;;  %v2198_v0 = vpack.c.bf16 %v2193_v29, %v2191_v42  ;;  %v3946_v42 = vld [vmem:[%s5531_s3 + $0x150] ss:$8 sps:$4 sm:$0xff]   ;;  %v3954_v29 = vld [vmem:[%s5531_s3 + $0x144] ss:$8 sps:$4 sm:$0xff]  }
 0x3b2   : > { %v1699_v41 = vsel %vm327_vm0, %v1692_v1, %v1696_v16  ;;  %v1701_v31 = vsel %vm327_vm0, %v1696_v16, %v1692_v1 }
 0x3b3   : > { %2221 = vmatprep.subr.bf16.mxu1 %v2198_v0  ;;  %v1703_v44 = vmul.f32 %v4358_v24, %v1701_v31  ;;  %v1704_v45 = vmul.f32 %v4351_v22, %v1699_v41 }
 0x3b4   : > { %2222 = vmatpush1.bf16.msra.mxu1 %v2197_v37 }
 0x3b5   : > { %v1815_v32 = vpop.permute.xlu1 %1814  ;;  %2379 = vmatprep.subr.mxu1 %v4660_v50  ;;  %v1698_v14 = vpop.permute.xlu0 %1697 }
 0x3b6   : > { %v1700_v3 = vsel %vm327_vm0, %v1694_v43, %v1698_v14  ;;  %v1702_v18 = vsel %vm327_vm0, %v1698_v14, %v1694_v43  ;;  %vm3291_vm0 = vcmask 64512  }
 0x3b7   : > { %v1705_v49 = vmul.f32 %v4358_v24, %v1702_v18  ;;  %v1706_v2 = vmul.f32 %v4351_v22, %v1700_v3  ;;  %3673 = vmatmul.mubr.msk.bf16.vlgmr.msra.gmra.mxu1 %vm346_vm8, %v3925_v40  ;;  %v3926_v24 = vld [vmem:[%s5529_s1 + $0x98] sm:$0xff]   ;;  %v3952_v40 = vld [vmem:[%s5531_s3 + $0x140] ss:$8 sps:$4 sm:$0xff]   ;;  %v3966_v18 = vld [vmem:[%s5531_s3 + $0x124] ss:$8 sps:$4 sm:$0xff]  }
 0x3b8   : > { %2380 = vmatpush1.msra.mxu1 %v4628_v38  ;;  %2415 = vmatprep.mubr.f32.mxu1 %v4152_v21 }
 0x3b9   : > { %v1710_v52 = vpack.c.bf16 %v1705_v49, %v1703_v44  ;;  %v1819_v9 = vpop.permute.xlu1 %1818  ;;  %2381 = vmatprep.subr.mxu1 %v4654_v6  ;;  %v1817_v23 = vpop.permute.xlu0 %1816  ;;  %v1711_v26 = vpack.c.bf16 %v1706_v2, %v1704_v45 }
 0x3ba   : > { %2382 = vmatpush1.msra.mxu1 %v4624_v25  ;;  %v1824_v22 = vsel %vm452_vm13, %v1819_v9, %v1815_v32  ;;  %v1822_v28 = vsel %vm452_vm13, %v1815_v32, %v1819_v9  ;;  %v3958_v32 = vld [vmem:[%s5531_s3 + $0x130] ss:$8 sps:$4 sm:$0xff]  }
 0x3bb   : > { %1734 = vmatprep.subr.bf16.mxu0 %v1711_v26  ;;  %2852 = vmatprep.subr.bf16.mxu1 %v3936_v55  ;;  %v1826_v5 = vmul.f32 %v4429_v59, %v1824_v22  ;;  %v1827_v63 = vmul.f32 %v4432_v60, %v1822_v28  ;;  %v3964_v55 = vld [vmem:[%s5531_s3 + $0x120] ss:$8 sps:$4 sm:$0xff]   ;;  %v3930_v26 = vld [vmem:[%s5529_s1 + $0xd0] sm:$0xff]   ;;  %v3939_v22 = vld [vmem:[%s5531_s3 + $0x64] ss:$8 sps:$4 sm:$0xff]  }
 0x3bc   : > { %1735 = vmatpush1.bf16.msra.mxu0 %v1710_v52  ;;  %v3937_v28 = vld [vmem:[%s5531_s3 + $0x60] ss:$8 sps:$4 sm:$0xff]  }
 0x3bd   : > { %v2103_v35 = vpop.permute.xlu1 %2102  ;;  %v1821_v54 = vpop.permute.xlu0 %1820 }
 0x3be   : > { %v1823_v39 = vsel %vm452_vm13, %v1817_v23, %v1821_v54  ;;  %v1825_v8 = vsel %vm452_vm13, %v1821_v54, %v1817_v23  ;;  %v3943_v54 = vld [vmem:[%s5531_s3 + $0x50] ss:$8 sps:$4 sm:$0xff]  }
 0x3bf   : > { %v1828_v34 = vmul.f32 %v4429_v59, %v1825_v8  ;;  %v1829_v57 = vmul.f32 %v4432_v60, %v1823_v39  ;;  %3647 = vmatmul.mubr.msk.bf16.vlgmr.msra.gmra.mxu0 %vm346_vm8, %v3926_v24  ;;  %3678 = vmatmul.mubr.msk.f32.vlgmr.msra.gmra.mxu1 %vm346_vm8, %v228_v58  ;;  %v3948_v59 = vld [vmem:[%s5531_s3 + $0x154] ss:$8 sps:$4 sm:$0xff]   ;;  %v3927_v60 = vld [vmem:[%s5529_s1 + $0xa0] sm:$0xff]   ;;  %v3982_v39 = vld [vmem:[%s5531_s3 + $0x1f0] ss:$8 sps:$4 sm:$0xff]  }
 0x3c0   : > { %1875 = vmatprep.mubr.bf16.mxu0 %v4145_v4  ;;  %2853 = vmatpush1.bf16.msra.mxu1 %v3934_v53  ;;  %v3972_v24 = vld [vmem:[%s5531_s3 + $0x114] ss:$8 sps:$4 sm:$0xff]   ;;  %v3978_v53 = vld [vmem:[%s5531_s3 + $0x104] ss:$8 sps:$4 sm:$0xff]   ;;  %v3949_v8 = vld [vmem:[%s5531_s3 + $0x40] ss:$8 sps:$4 sm:$0xff]  }
 0x3c1   : > { %v1833_v15 = vpack.c.bf16 %v1828_v34, %v1826_v5  ;;  %v2107_v46 = vpop.permute.xlu1 %2106  ;;  %v2105_v1 = vpop.permute.xlu0 %2104  ;;  %v1834_v7 = vpack.c.bf16 %v1829_v57, %v1827_v63  ;;  %2854 = vmatprep.subr.bf16.mxu1 %v3942_v36  ;;  %v3945_v58 = vld [vmem:[%s5531_s3 + $0x54] ss:$8 sps:$4 sm:$0xff]   ;;  %v3951_v36 = vld [vmem:[%s5531_s3 + $0x44] ss:$8 sps:$4 sm:$0xff]   ;;  %v3988_v57 = vld [vmem:[%s5531_s3 + $0x1e0] ss:$8 sps:$4 sm:$0xff]  }
 0x3c2   : > { %v2112_v20 = vsel %vm743_vm11, %v2107_v46, %v2103_v35  ;;  %v2110_v17 = vsel %vm743_vm11, %v2103_v35, %v2107_v46  ;;  %v3976_v35 = vld [vmem:[%s5531_s3 + $0x100] ss:$8 sps:$4 sm:$0xff]   ;;  %v3984_v5 = vld [vmem:[%s5531_s3 + $0x1f4] ss:$8 sps:$4 sm:$0xff]   ;;  %v3990_v34 = vld [vmem:[%s5531_s3 + $0x1e4] ss:$8 sps:$4 sm:$0xff]  }
 0x3c3   : > { %1857 = vmatprep.subr.bf16.mxu0 %v1834_v7  ;;  %v2115_v37 = vmul.f32 %v4543_v62, %v2112_v20  ;;  %v3957_v63 = vld [vmem:[%s5531_s3 + $0x34] ss:$8 sps:$4 sm:$0xff]   ;;  %v3961_v7 = vld [vmem:[%s5531_s3 + $0x20] ss:$8 sps:$4 sm:$0xff]  }
 0x3c4   : > { %1858 = vmatpush1.bf16.msra.mxu0 %v1833_v15  ;;  %2855 = vmatpush1.bf16.msra.mxu1 %v3940_v12  ;;  %v3955_v12 = vld [vmem:[%s5531_s3 + $0x30] ss:$8 sps:$4 sm:$0xff]   ;;  %v3963_v15 = vld [vmem:[%s5531_s3 + $0x24] ss:$8 sps:$4 sm:$0xff]   ;;  %v3996_v46 = vld [vmem:[%s5531_s3 + $0x1d4] ss:$8 sps:$4 sm:$0xff]  }
 0x3c5   : > { %v2255_v27 = vpop.permute.xlu1 %2254  ;;  %v2109_v30 = vpop.permute.xlu0 %2108  ;;  %1993 = vmatprep.subr.bf16.mxu0 %v1970_v19  ;;  %2856 = vmatprep.subr.bf16.mxu1 %v3948_v59  ;;  %v3969_v59 = vld [vmem:[%s5531_s3 + $0x14] ss:$8 sps:$4 sm:$0xff]   ;;  %v4000_v20 = vld [vmem:[%s5531_s3 + $0x1c0] ss:$8 sps:$4 sm:$0xff]  }
 0x3c6   : > { %v2113_v56 = vsel %vm743_vm11, %v2109_v30, %v2105_v1  ;;  %v2111_v16 = vsel %vm743_vm11, %v2105_v1, %v2109_v30  ;;  %v3994_v1 = vld [vmem:[%s5531_s3 + $0x1d0] ss:$8 sps:$4 sm:$0xff]   ;;  %v3975_v30 = vld [vmem:[%s5531_s3 + $0x4] ss:$8 sps:$4 sm:$0xff]  }
 0x3c7   : > { %v2117_v13 = vmul.f32 %v4543_v62, %v2113_v56  ;;  %3653 = vmatmul.mubr.msk.bf16.vlgmr.msra.gmra.mxu0 %vm346_vm8, %v3927_v60  ;;  %v2116_v62 = vmul.f32 %v4540_v61, %v2111_v16  ;;  %v4002_v60 = vld [vmem:[%s5531_s3 + $0x1c4] ss:$8 sps:$4 sm:$0xff]   ;;  %v4006_v56 = vld [vmem:[%s5531_s3 + $0x1b0] ss:$8 sps:$4 sm:$0xff]  }
 0x3c8   : > { %1994 = vmatpush1.bf16.msra.mxu0 %v1969_v33  ;;  %2011 = vmatprep.mubr.bf16.mxu0 %v4145_v4  ;;  %v2114_v33 = vmul.f32 %v4540_v61, %v2110_v17  ;;  %v4014_v16 = vld [vmem:[%s5531_s3 + $0x1a4] ss:$8 sps:$4 sm:$0xff]   ;;  %v3979_v17 = vld [vmem:[%s5531_s3 + $0xf0] ss:$8 sps:$4 sm:$0xff]  }
 0x3c9   : > { %v2259_v19 = vpop.permute.xlu1 %2258  ;;  %v2257_v43 = vpop.permute.xlu0 %2256  ;;  %v2122_v0 = vpack.c.bf16 %v2117_v13, %v2115_v37  ;;  %2857 = vmatpush1.bf16.msra.mxu1 %v3946_v42  ;;  %v4008_v42 = vld [vmem:[%s5531_s3 + $0x1b4] ss:$8 sps:$4 sm:$0xff]   ;;  %v4012_v13 = vld [vmem:[%s5531_s3 + $0x1a0] ss:$8 sps:$4 sm:$0xff]  }
 0x3ca   : > { %2858 = vmatprep.subr.bf16.mxu1 %v3954_v29  ;;  %v2264_v41 = vsel %vm897_vm5, %v2259_v19, %v2255_v27  ;;  %v2121_v14 = vpack.c.bf16 %v2116_v62, %v2114_v33  ;;  %v2262_v49 = vsel %vm897_vm5, %v2255_v27, %v2259_v19  ;;  %v3967_v27 = vld [vmem:[%s5531_s3 + $0x10] ss:$8 sps:$4 sm:$0xff]   ;;  %v3973_v29 = vld [vmem:[%s5531_s3] ss:$8 sps:$4 sm:$0xff]   ;;  %v3981_v37 = vld [vmem:[%s5531_s3 + $0xf4] ss:$8 sps:$4 sm:$0xff]  }
 0x3cb   : > { %2145 = vmatprep.subr.bf16.mxu0 %v2122_v0  ;;  %v2267_v61 = vmul.f32 %v4603_v48, %v2264_v41  ;;  %v2266_v9 = vmul.f32 %v4600_v47, %v2262_v49  ;;  %v3987_v19 = vld [vmem:[%s5531_s3 + $0xe4] ss:$8 sps:$4 sm:$0xff]   ;;  %v4018_v0 = vld [vmem:[%s5531_s3 + $0x190] ss:$8 sps:$4 sm:$0xff]   ;;  %v3993_v62 = vld [vmem:[%s5531_s3 + $0xd4] ss:$8 sps:$4 sm:$0xff]  }
 0x3cc   : > { %v3991_v33 = vld [vmem:[%s5531_s3 + $0xd0] ss:$8 sps:$4 sm:$0xff]   ;;  %v3999_v41 = vld [vmem:[%s5531_s3 + $0xc4] ss:$8 sps:$4 sm:$0xff]   ;;  %v4021_v49 = vld [vmem:[%s5531_s3 + $0x80] ss:$8 sps:$4 sm:$0xff]  }
 0x3cd   : > { %v2261_v31 = vpop.permute.xlu0 %2260  ;;  %2859 = vmatpush1.bf16.msra.mxu1 %v3952_v40  ;;  %v3985_v40 = vld [vmem:[%s5531_s3 + $0xe0] ss:$8 sps:$4 sm:$0xff]  }
 0x3ce   : > { %v2265_v3 = vsel %vm897_vm5, %v2261_v31, %v2257_v43  ;;  %2860 = vmatprep.subr.bf16.mxu1 %v3960_v51  ;;  %v2263_v44 = vsel %vm897_vm5, %v2257_v43, %v2261_v31  ;;  %v4020_v43 = vld [vmem:[%s5531_s3 + $0x194] ss:$8 sps:$4 sm:$0xff]   ;;  %v4026_v51 = vld [vmem:[%s5531_s3 + $0x184] ss:$8 sps:$4 sm:$0xff]   ;;  %v3997_v31 = vld [vmem:[%s5531_s3 + $0xc0] ss:$8 sps:$4 sm:$0xff]  }
 0x3cf   : > { %v2269_v45 = vmul.f32 %v4603_v48, %v2265_v3  ;;  %3661 = vmatmul.mubr.msk.bf16.vlgmr.msra.gmra.mxu0 %vm346_vm8, %v3928_v11  ;;  %v2268_v52 = vmul.f32 %v4600_v47, %v2263_v44  ;;  %v3929_v48 = vld [vmem:[%s5529_s1 + $0xc0] sm:$0xff]   ;;  %v3931_v47 = vld [vmem:[%s5531_s3 + $0x70] ss:$8 sps:$4 sm:$0xff]  }
 0x3d0   : > { %2146 = vmatpush1.bf16.msra.mxu0 %v2121_v14  ;;  %2163 = vmatprep.mubr.bf16.mxu0 %v4145_v4  ;;  %v4024_v11 = vld [vmem:[%s5531_s3 + $0x180] ss:$8 sps:$4 sm:$0xff]   ;;  %v4003_v14 = vld [vmem:[%s5531_s3 + $0xb0] ss:$8 sps:$4 sm:$0xff]   ;;  %v4011_v3 = vld [vmem:[%s5531_s3 + $0xa4] ss:$8 sps:$4 sm:$0xff]  }
 0x3d1   : > { %v2274_v2 = vpack.c.bf16 %v2269_v45, %v2267_v61  ;;  %2861 = vmatpush1.bf16.msra.mxu1 %v3958_v32  ;;  %v2273_v23 = vpack.c.bf16 %v2268_v52, %v2266_v9  ;;  %v4005_v32 = vld [vmem:[%s5531_s3 + $0xb4] ss:$8 sps:$4 sm:$0xff]   ;;  %v4015_v44 = vld [vmem:[%s5531_s3 + $0x90] ss:$8 sps:$4 sm:$0xff]   ;;  %v4023_v45 = vld [vmem:[%s5531_s3 + $0x84] ss:$8 sps:$4 sm:$0xff]  }
 0x3d2   : > { %2862 = vmatprep.subr.bf16.mxu1 %v3966_v18  ;;  %v4009_v18 = vld [vmem:[%s5531_s3 + $0xa0] ss:$8 sps:$4 sm:$0xff]   ;;  %v4017_v61 = vld [vmem:[%s5531_s3 + $0x94] ss:$8 sps:$4 sm:$0xff]  }
 0x3d3   : > { %2297 = vmatprep.subr.bf16.mxu0 %v2274_v2 }
 0x3d5   : > { %2863 = vmatpush1.bf16.msra.mxu1 %v3964_v55 }
 0x3d6   : > { %2864 = vmatprep.subr.bf16.mxu1 %v3972_v24 }
 0x3d7   : > { %3669 = vmatmul.mubr.msk.bf16.vlgmr.msra.gmra.mxu0 %vm346_vm8, %v3929_v48 }
 0x3d8   : > { %2298 = vmatpush1.bf16.msra.mxu0 %v2273_v23  ;;  %2315 = vmatprep.mubr.bf16.mxu0 %v4145_v4  ;;  %v3970_v4 = vld [vmem:[%s5531_s3 + $0x110] ss:$8 sps:$4 sm:$0xff]  }
 0x3d9   : > { %2618 = vmatprep.subr.bf16.mxu0 %v3933_v10  ;;  %2865 = vmatpush1.bf16.msra.mxu1 %v3970_v4 }
 0x3da   : > { %2866 = vmatprep.subr.bf16.mxu1 %v3978_v53 }
 0x3dd   : > { %2867 = vmatpush1.bf16.msra.mxu1 %v3976_v35 }
 0x3de   : > { %2868 = vmatprep.subr.bf16.mxu1 %v3984_v5 }
 0x3df   : > { %3677 = vmatmul.mubr.msk.bf16.vlgmr.msra.gmra.mxu0 %vm346_vm8, %v3930_v26 }
 0x3e0   : > { %2619 = vmatpush1.bf16.msra.mxu0 %v3931_v47 }
 0x3e1   : > { %2620 = vmatprep.subr.bf16.mxu0 %v3939_v22  ;;  %2869 = vmatpush2.bf16.msra.mxu1 %v3982_v39 }
 0x3e2   : > { %2870 = vmatprep.subr.bf16.mxu1 %v3990_v34 }
 0x3e4   : > { %2621 = vmatpush1.bf16.msra.mxu0 %v3937_v28 }
 0x3e5   : > { %2622 = vmatprep.subr.bf16.mxu0 %v3945_v58  ;;  %2871 = vmatpush2.bf16.msra.mxu1 %v3988_v57 }
 0x3e6   : > { %2872 = vmatprep.subr.bf16.mxu1 %v3996_v46 }
 0x3e8   : > { %2623 = vmatpush1.bf16.msra.mxu0 %v3943_v54 }
 0x3e9   : > { %2624 = vmatprep.subr.bf16.mxu0 %v3951_v36  ;;  %2873 = vmatpush2.bf16.msra.mxu1 %v3994_v1 }
 0x3ea   : > { %2874 = vmatprep.subr.bf16.mxu1 %v4002_v60 }
 0x3ec   : > { %2625 = vmatpush1.bf16.msra.mxu0 %v3949_v8 }
 0x3ed   : > { %2626 = vmatprep.subr.bf16.mxu0 %v3957_v63  ;;  %2875 = vmatpush2.bf16.msra.mxu1 %v4000_v20 }
 0x3ee   : > { %2876 = vmatprep.subr.bf16.mxu1 %v4008_v42 }
 0x3f0   : > { %2627 = vmatpush1.bf16.msra.mxu0 %v3955_v12 }
 0x3f1   : > { %2628 = vmatprep.subr.bf16.mxu0 %v3963_v15  ;;  %2877 = vmatpush2.bf16.msra.mxu1 %v4006_v56 }
 0x3f2   : > { %2878 = vmatprep.subr.bf16.mxu1 %v4014_v16 }
 0x3f4   : > { %2629 = vmatpush1.bf16.msra.mxu0 %v3961_v7 }
 0x3f5   : > { %2630 = vmatprep.subr.bf16.mxu0 %v3969_v59  ;;  %2879 = vmatpush2.bf16.msra.mxu1 %v4012_v13 }
 0x3f6   : > { %2880 = vmatprep.subr.bf16.mxu1 %v4020_v43 }
 0x3f8   : > { %2631 = vmatpush1.bf16.msra.mxu0 %v3967_v27 }
 0x3f9   : > { %2632 = vmatprep.subr.bf16.mxu0 %v3975_v30  ;;  %2881 = vmatpush2.bf16.msra.mxu1 %v4018_v0 }
 0x3fa   : > { %2882 = vmatprep.subr.bf16.mxu1 %v4026_v51 }
 0x3fc   : > { %2633 = vmatpush1.bf16.msra.mxu0 %v3973_v29 }
 0x3fd   : > { %2634 = vmatprep.subr.bf16.mxu0 %v3981_v37  ;;  %2883 = vmatpush2.bf16.msra.mxu1 %v4024_v11 }
 0x400   : > { %2635 = vmatpush2.bf16.msra.mxu0 %v3979_v17 }
 0x401   : > { %2636 = vmatprep.subr.bf16.mxu0 %v3987_v19 }
 0x404   : > { %2637 = vmatpush2.bf16.msra.mxu0 %v3985_v40 }
 0x405   : > { %2638 = vmatprep.subr.bf16.mxu0 %v3993_v62 }
 0x408   : > { %2639 = vmatpush2.bf16.msra.mxu0 %v3991_v33 }
 0x409   : > { %2640 = vmatprep.subr.bf16.mxu0 %v3999_v41 }
 0x40c   : > { %2641 = vmatpush2.bf16.msra.mxu0 %v3997_v31 }
 0x40d   : > { %2642 = vmatprep.subr.bf16.mxu0 %v4005_v32 }
 0x410   : > { %2643 = vmatpush2.bf16.msra.mxu0 %v4003_v14 }
 0x411   : > { %2644 = vmatprep.subr.bf16.mxu0 %v4011_v3 }
 0x414   : > { %2645 = vmatpush2.bf16.msra.mxu0 %v4009_v18 }
 0x415   : > { %2646 = vmatprep.subr.bf16.mxu0 %v4017_v61 }
 0x418   : > { %2647 = vmatpush2.bf16.msra.mxu0 %v4015_v44 }
 0x419   : > { %2648 = vmatprep.subr.bf16.mxu0 %v4023_v45 }
 0x41c   : > { %2649 = vmatpush2.bf16.msra.mxu0 %v4021_v49 }
 0x45f   : > { %v1805_v2 = vpop.f32.mrf.mxu1 }
 0x461   : > { %v1807_v55 = vpop.f32.mrf.mxu1 }
 0x463   : > { %v1809_v52 = vpop.f32.mrf.mxu1 }
 0x465   : > { %v1811_v48 = vpop.f32.mrf.mxu1 }
 0x467   : > { %v1953_v9 = vpop.f32.mrf.mxu1 }
 0x469   : > { %v1955_v10 = vpop.f32.mrf.mxu1 }
 0x46b   : > { %v1957_v23 = vpop.f32.mrf.mxu1 }
 0x46d   : > { %v1959_v26 = vpop.f32.mrf.mxu1 }
 0x46f   : > { %v2089_v47 = vpop.f32.mrf.mxu1 }
 0x471   : > { %v2091_v22 = vpop.f32.mrf.mxu1 }
 0x473   : > { %v2093_v24 = vpop.f32.mrf.mxu1 }
 0x475   : > { %v2095_v4 = vpop.f32.mrf.mxu1 }
 0x477   : > { %v2241_v28 = vpop.f32.mrf.mxu1 }
 0x479   : > { %v2243_v58 = vpop.f32.mrf.mxu1 }
 0x47b   : > { %v2245_v53 = vpop.f32.mrf.mxu1 }
 0x47d   : > { %v2247_v35 = vpop.f32.mrf.mxu1 }
 0x47f   : > { %v1754_v54 = vpop.f32.mrf.mxu0  ;;  %v2417_v36 = vpop.f32.mrf.mxu1 }
 0x480   : > { %v1806_v5 = vadd.f32 %v1805_v2, %v1754_v54  ;;  %v5313_v39 = vmax.f32 %v2417_v36, 0.0 }
 0x481   : > { %v1756_v8 = vpop.f32.mrf.mxu0  ;;  %v2419_v63 = vpop.f32.mrf.mxu1 }
 0x482   : > { %v1808_v34 = vadd.f32 %v1807_v55, %v1756_v8  ;;  %v5315_v57 = vmax.f32 %v2419_v63, 0.0  ;;  %v2424_v1 = vpack.c.bf16 %v5313_v39, %v5313_v39  ;;  %v4050_v8 = vld [vmem:[%s5532_s4 + $0xd4] ss:$8 sps:$4 sm:$0xff]   ;;  %v4048_v63 = vld [vmem:[%s5532_s4 + $0xd0] ss:$8 sps:$4 sm:$0xff]  }
 0x483   : > { %v1758_v12 = vpop.f32.mrf.mxu0 }
 0x484   : > { %v2425_v15 = vpack.c.bf16 %v5315_v57, %v5315_v57  ;;  %v1810_v46 = vadd.f32 %v1809_v52, %v1758_v12  ;;  %v4054_v12 = vld [vmem:[%s5532_s4 + $0xc0] ss:$8 sps:$4 sm:$0xff]  }
 0x485   : > { %v1760_v7 = vpop.f32.mrf.mxu0 }
 0x486   : > { %v1812_v59 = vadd.f32 %v1811_v48, %v1760_v7  ;;  %2650 = vmatprep.mubr.bf16.mxu0 %v2425_v15  ;;  %2884 = vmatprep.mubr.bf16.mxu1 %v2425_v15  ;;  %v4062_v15 = vld [vmem:[%s5532_s4 + $0xb4] ss:$8 sps:$4 sm:$0xff]  }
 0x487   : > { %v1877_v60 = vpop.f32.mrf.mxu0  ;;  %2651 = vmatmul.mubr.bf16.vlgmr.msra.gmra.mxu0 %v2424_v1  ;;  %2885 = vmatmul.mubr.bf16.vlgmr.msra.gmra.mxu1 %v2424_v1 }
 0x488   : > { %v1886_v20 = vadd.f32 %v1877_v60, %v1806_v5  ;;  %2963 = vmatprep.mubr.f32.mxu0 %v4152_v21  ;;  %v4042_v5 = vld [vmem:[%s5532_s4 + $0xe0] ss:$8 sps:$4 sm:$0xff]  }
 0x489   : > { %v1879_v27 = vpop.f32.mrf.mxu0 }
 0x48a   : > { %v1887_v30 = vadd.f32 %v1879_v27, %v1808_v34  ;;  %v1962_v42 = vadd.f32 %v1953_v9, %v1886_v20  ;;  %v4056_v34 = vld [vmem:[%s5532_s4 + $0xc4] ss:$8 sps:$4 sm:$0xff]   ;;  %v4029_v27 = vld [vmem:[%s5532_s4 + $0x74] ss:$8 sps:$4 sm:$0xff]  }
 0x48b   : > { %v1881_v56 = vpop.f32.mrf.mxu0 }
 0x48c   : > { %v1888_v29 = vadd.f32 %v1881_v56, %v1810_v46  ;;  %v1963_v37 = vadd.f32 %v1955_v10, %v1887_v30  ;;  %v4060_v46 = vld [vmem:[%s5532_s4 + $0xb0] ss:$8 sps:$4 sm:$0xff]  }
 0x48d   : > { %v1883_v16 = vpop.f32.mrf.mxu0  ;;  %v229_v56 = vld [vmem:[%s5530_s2 + $0x10] sm:$0xff] }
 0x48e   : > { %v1889_v13 = vadd.f32 %v1883_v16, %v1812_v59  ;;  %v1964_v17 = vadd.f32 %v1957_v23, %v1888_v29  ;;  %v4027_v29 = vld [vmem:[%s5532_s4 + $0x70] ss:$8 sps:$4 sm:$0xff]  }
 0x48f   : > { %v2013_v19 = vpop.f32.mrf.mxu0 }
 0x490   : > { %v2022_v43 = vadd.f32 %v2013_v19, %v1962_v42  ;;  %v1965_v0 = vadd.f32 %v1959_v26, %v1889_v13  ;;  %v4033_v19 = vld [vmem:[%s5532_s4 + $0x60] ss:$8 sps:$4 sm:$0xff]  }
 0x491   : > { %v2015_v40 = vpop.f32.mrf.mxu0 }
 0x492   : > { %v2023_v62 = vadd.f32 %v2015_v40, %v1963_v37  ;;  %v2098_v51 = vadd.f32 %v2089_v47, %v2022_v43  ;;  %v4035_v37 = vld [vmem:[%s5532_s4 + $0x64] ss:$8 sps:$4 sm:$0xff]   ;;  %v4041_v43 = vld [vmem:[%s5532_s4 + $0x54] ss:$8 sps:$4 sm:$0xff]  }
 0x493   : > { %v2017_v11 = vpop.f32.mrf.mxu0  ;;  %v4047_v40 = vld [vmem:[%s5532_s4 + $0x44] ss:$8 sps:$4 sm:$0xff]  }
 0x494   : > { %v2024_v33 = vadd.f32 %v2017_v11, %v1964_v17  ;;  %v2099_v41 = vadd.f32 %v2091_v22, %v2023_v62  ;;  %v230_v17 = vld [vmem:[%s5530_s2 + $0x18] sm:$0xff]  ;;  %v4045_v62 = vld [vmem:[%s5532_s4 + $0x40] ss:$8 sps:$4 sm:$0xff]  }
 0x495   : > { %v2019_v31 = vpop.f32.mrf.mxu0  ;;  %v4051_v11 = vld [vmem:[%s5532_s4 + $0x30] ss:$8 sps:$4 sm:$0xff]  }
 0x496   : > { %v2025_v32 = vadd.f32 %v2019_v31, %v1965_v0  ;;  %v2100_v14 = vadd.f32 %v2093_v24, %v2024_v33  ;;  %v4039_v0 = vld [vmem:[%s5532_s4 + $0x50] ss:$8 sps:$4 sm:$0xff]   ;;  %v4059_v33 = vld [vmem:[%s5532_s4 + $0x24] ss:$8 sps:$4 sm:$0xff]   ;;  %v4065_v31 = vld [vmem:[%s5532_s4 + $0x14] ss:$8 sps:$4 sm:$0xff]  }
 0x497   : > { %v2165_v3 = vpop.f32.mrf.mxu0 }
 0x498   : > { %v2174_v18 = vadd.f32 %v2165_v3, %v2098_v51  ;;  %v2101_v61 = vadd.f32 %v2095_v4, %v2025_v32  ;;  %v4030_v4 = vld [vmem:[%s5532_s4 + $0x100] ss:$8 sps:$4 sm:$0xff]   ;;  %v4053_v51 = vld [vmem:[%s5532_s4 + $0x34] ss:$8 sps:$4 sm:$0xff]   ;;  %v4063_v32 = vld [vmem:[%s5532_s4 + $0x10] ss:$8 sps:$4 sm:$0xff]  }
 0x499   : > { %v2167_v44 = vpop.f32.mrf.mxu0  ;;  %v4071_v3 = vld [vmem:[%s5532_s4 + $0x4] ss:$8 sps:$4 sm:$0xff]  }
 0x49a   : > { %v2175_v45 = vadd.f32 %v2167_v44, %v2099_v41  ;;  %v2250_v49 = vadd.f32 %v2241_v28, %v2174_v18  ;;  %v4032_v28 = vld [vmem:[%s5532_s4 + $0x104] ss:$8 sps:$4 sm:$0xff]   ;;  %v4057_v41 = vld [vmem:[%s5532_s4 + $0x20] ss:$8 sps:$4 sm:$0xff]   ;;  %v4074_v44 = vld [vmem:[%s5532_s4 + $0x94] ss:$8 sps:$4 sm:$0xff]  }
 0x49b   : > { %v2169_v2 = vpop.f32.mrf.mxu0  ;;  %3114 = vmatprep.subr.bf16.mxu1 %v4032_v28  ;;  %v4066_v18 = vld [vmem:[%s5532_s4 + $0xa0] ss:$8 sps:$4 sm:$0xff]  }
 0x49c   : > { %v2176_v55 = vadd.f32 %v2169_v2, %v2100_v14  ;;  %v2251_v52 = vadd.f32 %v2243_v58, %v2175_v45  ;;  %v4038_v58 = vld [vmem:[%s5532_s4 + $0xf4] ss:$8 sps:$4 sm:$0xff]   ;;  %3115 = vmatpush1.bf16.msra.mxu1 %v4030_v4  ;;  %v4068_v14 = vld [vmem:[%s5532_s4 + $0xa4] ss:$8 sps:$4 sm:$0xff]   ;;  %v4075_v2 = vld [vmem:[%s5532_s4 + $0x80] ss:$8 sps:$4 sm:$0xff]  }
 0x49d   : > { %v2171_v48 = vpop.f32.mrf.mxu0  ;;  %3116 = vmatprep.subr.bf16.mxu1 %v4038_v58  ;;  %v4077_v45 = vld [vmem:[%s5532_s4 + $0x84] ss:$8 sps:$4 sm:$0xff]  }
 0x49e   : > { %v2177_v9 = vadd.f32 %v2171_v48, %v2101_v61  ;;  %v2252_v10 = vadd.f32 %v2245_v53, %v2176_v55  ;;  %v4036_v53 = vld [vmem:[%s5532_s4 + $0xf0] ss:$8 sps:$4 sm:$0xff]   ;;  %v4069_v61 = vld [vmem:[%s5532_s4] ss:$8 sps:$4 sm:$0xff]   ;;  %v4080_v55 = vld [vmem:[%s5532_s4 + $0x114] ss:$8 sps:$4 sm:$0xff]  }
 0x49f   : > { %v2317_v23 = vpop.f32.mrf.mxu0 }
 0x4a0   : > { %v5322_v26 = vadd.f32 %v2317_v23, %v2250_v49  ;;  %v5324_v47 = vadd.f32 %v2247_v35, %v2177_v9  ;;  %v4044_v35 = vld [vmem:[%s5532_s4 + $0xe4] ss:$8 sps:$4 sm:$0xff]   ;;  %3117 = vmatpush1.bf16.msra.mxu1 %v4036_v53  ;;  %v4072_v49 = vld [vmem:[%s5532_s4 + $0x90] ss:$8 sps:$4 sm:$0xff]  }
 0x4a1   : > { %v2319_v22 = vpop.f32.mrf.mxu0  ;;  %3118 = vmatprep.subr.bf16.mxu1 %v4044_v35 }
 0x4a2   : > { %v5326_v54 = vadd.f32 %v2319_v22, %v2251_v52  ;;  %v4078_v52 = vld [vmem:[%s5532_s4 + $0x110] ss:$8 sps:$4 sm:$0xff]  }
 0x4a3   : > { %v2321_v24 = vpop.f32.mrf.mxu0 }
 0x4a4   : > { %v5328_v36 = vadd.f32 %v2321_v24, %v2252_v10  ;;  %3119 = vmatpush1.bf16.msra.mxu1 %v4042_v5 }
 0x4a5   : > { %3120 = vmatprep.subr.bf16.mxu1 %v4050_v8  ;;  %v5366_v1 = vpop.f32.mrf.mxu0 }
 0x4a8   : > { %3121 = vmatpush1.bf16.msra.mxu1 %v4048_v63 }
 0x4a9   : > { %3122 = vmatprep.subr.bf16.mxu1 %v4056_v34 }
 0x4ac   : > { %3123 = vmatpush1.bf16.msra.mxu1 %v4054_v12 }
 0x4ad   : > { %3124 = vmatprep.subr.bf16.mxu1 %v4062_v15 }
 0x4b0   : > { %3125 = vmatpush1.bf16.msra.mxu1 %v4060_v46 }
 0x4b1   : > { %3126 = vmatprep.subr.bf16.mxu1 %v4068_v14 }
 0x4b4   : > { %3127 = vmatpush1.bf16.msra.mxu1 %v4066_v18 }
 0x4b5   : > { %3128 = vmatprep.subr.bf16.mxu1 %v4074_v44 }
 0x4b8   : > { %3129 = vmatpush1.bf16.msra.mxu1 %v4072_v49 }
 0x4b9   : > { %3144 = vmatprep.subr.bf16.mxu1 %v4080_v55 }
 0x4bc   : > { %3145 = vmatpush2.bf16.msra.mxu1 %v4078_v52 }
 0x547   : > { %v2652_v7 = vpop.f32.mrf.mxu0  ;;  %v2886_v59 = vpop.f32.mrf.mxu1 }
 0x549   : > { %v2654_v60 = vpop.f32.mrf.mxu0  ;;  %v2888_v20 = vpop.f32.mrf.mxu1 }
 0x54a   : > { %2927 = vmatprep.subr.mxu0 %v2888_v20 }
 0x54b   : > { %v2656_v30 = vpop.f32.mrf.mxu0  ;;  %v2890_v42 = vpop.f32.mrf.mxu1  ;;  %2928 = vmatpush1.msra.mxu0 %v2886_v59 }
 0x54c   : > { %2929 = vmatprep.subr.mxu0 %v2654_v60  ;;  %v231_v42 = vld [vmem:[%s5530_s2 + $0x20] sm:$0xff] }
 0x54d   : > { %v2657_v16 = vpop.f32.mrf.mxu0  ;;  %v2891_v13 = vpop.f32.mrf.mxu1  ;;  %2930 = vmatpush1.msra.mxu0 %v2652_v7 }
 0x54e   : > { %3775 = vmatmul.mubr.msk.f32.vlgmr.msra.gmra.mxu0 %vm346_vm8, %v229_v56  ;;  %3248 = vmatprep.subr.bf16.mxu0 %v4029_v27  ;;  %v232_v56 = vld [vmem:[%s5530_s2 + $0x28] sm:$0xff] }
 0x54f   : > { %2969 = vmatprep.mubr.f32.mxu0 %v4152_v21  ;;  %3249 = vmatpush1.bf16.msra.mxu0 %v4027_v29 }
 0x550   : > { %3250 = vmatprep.subr.bf16.mxu0 %v4035_v37  ;;  %v2338_v37 = vpop.permute.xlu1 %2337 }
 0x552   : > { %3776 = vmatmul.mubr.msk.f32.gmra.mxu0 %vm346_vm8, %v230_v17  ;;  %v2333_v17 = vpop.permute.xlu0 %2332 }
 0x553   : > { %3251 = vmatpush1.bf16.msra.mxu0 %v4033_v19  ;;  %v2342_v19 = vadd.f32 %v2338_v37, %v5328_v36 }
 0x554   : > { %3252 = vmatprep.subr.bf16.mxu0 %v4041_v43 }
 0x557   : > { %3253 = vmatpush1.bf16.msra.mxu0 %v4039_v0  ;;  %v2341_v0 = vadd.f32 %v2333_v17, %v5326_v54 }
 0x558   : > { %3254 = vmatprep.subr.bf16.mxu0 %v4047_v40  ;;  %v2340_v40 = vadd.f32 %v2333_v17, %v5322_v26  ;;  %v233_v26 = vld [vmem:[%s5530_s2 + $0x30] sm:$0xff] }
 0x559   : > { %v2345_v36 = vadd.f32 %v2341_v0, %v4654_v6  ;;  %v3383_v6 = vpop.permute.xlu0 %3382 }
 0x55a   : > { %v2344_v54 = vadd.f32 %v2340_v40, %v4624_v25  ;;  %v3378_v25 = vpop.permute.xlu1 %3377 }
 0x55b   : > { %3255 = vmatpush1.bf16.msra.mxu0 %v4045_v62 }
 0x55c   : > { %3256 = vmatprep.subr.bf16.mxu0 %v4053_v51 }
 0x55f   : > { %3257 = vmatpush1.bf16.msra.mxu0 %v4051_v11 }
 0x560   : > { %3258 = vmatprep.subr.bf16.mxu0 %v4059_v33 }
 0x563   : > { %3259 = vmatpush1.bf16.msra.mxu0 %v4057_v41 }
 0x564   : > { %3260 = vmatprep.subr.bf16.mxu0 %v4065_v31 }
 0x567   : > { %3261 = vmatpush1.bf16.msra.mxu0 %v4063_v32 }
 0x568   : > { %3262 = vmatprep.subr.bf16.mxu0 %v4071_v3 }
 0x56b   : > { %3263 = vmatpush1.bf16.msra.mxu0 %v4069_v61 }
 0x56c   : > { %3278 = vmatprep.subr.bf16.mxu0 %v4077_v45 }
 0x56f   : > { %3279 = vmatpush2.bf16.msra.mxu0 %v4075_v2 }
 0x60e   : > { %v2965_v48 = vpop.f32.mrf.mxu0 }
 0x60f   : > { %v2976_v9 = vmax.f32 %v2965_v48, 0.0 }
 0x610   : > { %v2967_v10 = vpop.f32.mrf.mxu0 }
 0x611   : > { %v2977_v23 = vmax.f32 %v2967_v10, 0.0  ;;  %v2980_v4 = vpack.c.bf16 %v2976_v9, %v2976_v9 }
 0x612   : > { %v2971_v22 = vpop.f32.mrf.mxu0 }
 0x613   : > { %v2981_v24 = vpack.c.bf16 %v2977_v23, %v2977_v23  ;;  %v2978_v28 = vmax.f32 %v2971_v22, 0.0 }
 0x614   : > { %v2973_v58 = vpop.f32.mrf.mxu0 }
 0x615   : > { %v2979_v53 = vmax.f32 %v2973_v58, 0.0  ;;  %3832 = vmatprep.mubr.msk.bf16.mxu0 %vm346_vm8, %v2981_v24  ;;  %v3000_v5 = vpack.c.bf16 %v2978_v28, %v2978_v28 }
 0x616   : > { %3281 = vmatmul.mubr.bf16.vlgmr.msra.gmra.mxu0 %v2980_v4 }
 0x617   : > { %v3001_v35 = vpack.c.bf16 %v2979_v53, %v2979_v53  ;;  %3456 = vmatprep.mubr.f32.mxu0 %v4152_v21 }
 0x619   : > { %3813 = vmatprep.mubr.msk.bf16.mxu1 %vm346_vm8, %v3001_v35 }
 0x61a   : > { %3147 = vmatmul.mubr.bf16.vlgmr.msra.gmra.mxu1 %v3000_v5 }
 0x61b   : > { %3362 = vmatprep.mubr.f32.mxu1 %v4152_v21 }
 0x6d6   : > { %v3282_v8 = vpop.f32.mrf.mxu0 }
 0x6d8   : > { %v3284_v63 = vpop.f32.mrf.mxu0 }
 0x6da   : > { %v3148_v34 = vpop.f32.mrf.mxu1  ;;  %v3286_v12 = vpop.f32.mrf.mxu0 }
 0x6db   : > { %v3283_v15 = vadd.f32 %v3282_v8, %v3148_v34 }
 0x6dc   : > { %v3150_v46 = vpop.f32.mrf.mxu1  ;;  %v3287_v7 = vpop.f32.mrf.mxu0 }
 0x6dd   : > { %v3285_v59 = vadd.f32 %v3284_v63, %v3150_v46  ;;  %v3289_v27 = vadd.f32 %v3283_v15, %v5313_v39  ;;  %v2329_v39 = vadd.f32 %v5366_v1, %v5324_v47  ;;  %v2346_v47 = vadd.f32 %v2342_v19, %v4628_v38  ;;  %v234_v38 = vld [vmem:[%s5530_s2 + $0x38] sm:$0xff] }
 0x6de   : > { %v3152_v60 = vpop.f32.mrf.mxu1 }
 0x6df   : > { %v3290_v20 = vadd.f32 %v3285_v59, %v5315_v57  ;;  %v2343_v13 = vadd.f32 %v2338_v37, %v2329_v39 }
 0x6e0   : > { %v3153_v30 = vpop.f32.mrf.mxu1 }
 0x6e1   : > { %3328 = vmatprep.subr.mxu1 %v3290_v20 }
 0x6e2   : > { %3329 = vmatpush1.msra.mxu1 %v3289_v27 }
 0x6e3   : > { %3833 = vmatmul.mubr.msk.f32.vlgmr.msra.gmra.mxu1 %vm3291_vm0, %v231_v42 }
 0x6e4   : > { %3368 = vmatprep.mubr.f32.mxu1 %v4152_v21 }
 0x6e7   : > { %3834 = vmatmul.mubr.msk.f32.gmra.mxu1 %vm3291_vm0, %v232_v56 }
 0x6e8   : > { %3462 = vmatprep.mubr.f32.mxu1 %v4152_v21  ;;  %v2347_v21 = vadd.f32 %v2343_v13, %v4660_v50 }
 0x7a3   : > { %v3364_v57 = vpop.f32.mrf.mxu1 }
 0x7a5   : > { %v3366_v29 = vpop.f32.mrf.mxu1 }
 0x7a7   : > { %v3370_v16 = vpop.f32.mrf.mxu1 }
 0x7a9   : > { %v3372_v43 = vpop.f32.mrf.mxu1 }
 0x7aa   : > { %3416 = vmatprep.subr.mxu0 %v3372_v43  ;;  %3844 = vmatprep.subr.mxu1 %v3372_v43 }
 0x7ab   : > { %3417 = vmatpush1.msra.mxu0 %v3370_v16  ;;  %3848 = vmatpush1.msra.mxu1 %v3370_v16 }
 0x7ac   : > { %3418 = vmatprep.subr.mxu0 %v3366_v29  ;;  %3845 = vmatprep.subr.mxu1 %v3366_v29 }
 0x7ad   : > { %3419 = vmatpush1.msra.mxu0 %v3364_v57  ;;  %3849 = vmatpush1.msra.mxu1 %v3364_v57 }
 0x7ae   : > { %3420 = vmatprep.subr.mxu0 %v2347_v21  ;;  %3846 = vmatprep.subr.mxu1 %v2347_v21 }
 0x7af   : > { %3421 = vmatpush1.msra.mxu0 %v2346_v47  ;;  %3850 = vmatpush1.msra.mxu1 %v2346_v47 }
 0x7b0   : > { %3422 = vmatprep.subr.mxu0 %v2345_v36  ;;  %3847 = vmatprep.subr.mxu1 %v2345_v36 }
 0x7b1   : > { %3423 = vmatpush1.msra.mxu0 %v2344_v54  ;;  %3851 = vmatpush1.msra.mxu1 %v2344_v54 }
 0x7b2   : > { %3835 = vmatmul.mubr.msk.f32.vlgmr.msra.gmra.mxu0 %vm3385_vm7, %v233_v26  ;;  %3836 = vmatmul.mubr.msk.f32.vlgmr.msra.gmra.mxu1 %vm3385_vm7, %v234_v38 }
 0x872   : > { %v3458_v50 = vpop.f32.mrf.mxu0  ;;  %v3464_v1 = vpop.f32.mrf.mxu1 }
 0x873   : > { %v3459_v62 = vadd.f32 %v3458_v50, %v3378_v25  ;;  %v3465_v51 = vadd.f32 %v3464_v1, %v3383_v6 }
 0x874   : > { %v3460_v11 = vpop.f32.mrf.mxu0  ;;  %v3466_v33 = vpop.f32.mrf.mxu1 }
 0x875   : > { %3469 = vst [vmem:[%s217_s13] sm:$0xff] %v3459_v62  ;;  %3471 = vst [vmem:[%s217_s13 + $0x10] sm:$0xff] %v3465_v51  ;;  %v3461_v41 = vadd.f32 %v3460_v11, %v3378_v25  ;;  %v3467_v31 = vadd.f32 %v3466_v33, %v3383_v6 }
 0x877   : > { %3470 = vst [vmem:[%s217_s13 + $0x8] sm:$0xff] %v3461_v41  ;;  %3472 = vst [vmem:[%s217_s13 + $0x18] sm:$0xff] %v3467_v31 }
 0x878   : > { %4094 = shalt.err (!%p4091_p3)
}
 0x879   : > { %s4095_s25 = scalar_lea.hbm %s5485_s7, 512  ;;  %s4099_s11 = scalar_lea.hbm %s5533_s5, 1024 }
 0x87a   : > { %p4096_p4 = scmp.ne.s32.totalorder %s5485_s7, %s4095_s25  ;;  %p4100_p9 = scmp.lt.s32.totalorder %s5485_s7, %s5533_s5 }
 0x87b   : > { %p4101_p10 = scmp.lt.s32.totalorder %s4099_s11, %s4095_s25 }
 0x87c   : > { %p4097_p7 = pnand %p4096_p4, %p4223_p5 }
 0x87d   : > { %p4102_p11 = por %p4101_p10, %p4100_p9 }
 0x87e   : > { %p4098_p8 = pneg %p4097_p7 }
 0x880   : > { %p4103_p12 = pnand %p4102_p11, %p4098_p8 }
 0x882   : > { %4106 = shalt.err (!%p4103_p12)
}
 0x883   : > { %s4154_s16 = smov 256  }
 0x884   : > { %3852 = dma.vmem_to_hbm [thread:$0]  (%p4223_p5), %s5480_s14, 512, %s5485_s7, %s5487_s22, %s4154_s16, %s4154_s16, %s4143_s10  }
 0x885 PF: > { %p3858_p13 = scmp.ge.s32.totalorder %s4141_s21, 2  ;;  %s3502_s15 = sand.u32 1, %s4129_s18  }
 0x886   : > { %s3503_s6 = scalar_lea.sflag [#allocation3], %s3502_s15 }
 0x887   : > { %p3855_p0 = pnand %p3858_p13, %p4227_p6 }
 0x889   : > { %p3856_p1 = pneg %p3855_p0 }
 0x88b   : > { %4124 = dma.done.wait (%p3856_p1), %s3503_s6, 512  }
 0x88c   : > { %4126 = vsyncadd (%p3856_p1), %s3503_s6, 4294966784  ;;  %p15_p2 = scmp.ge.s32.totalorder %s4210_s24, 4   ;;  %s5552_s18 = smov %s4133_s19 }
 0x88d   : > { %s5553_s19 = smov %s4137_s20  ;;  %s5554_s20 = smov %s4221_s27 }
 0x88e   : > { %s5555_s21 = smov %s4210_s24  ;;  %17 = sbr.rel (!%p15_p2) target bundleno = 3 (0x3), region = 103 }
 0x893   :  { %3508 = vsyncpa [#allocation3], 1 }
 0x894   :  { %3510 = vsyncpa [#allocation3 + $0x1], 1 }

</bundles_post_ra>
